<compile_context>
chip_gen: v7x
topology: tpu7x:2x2x1
jax: 0.10.0
libtpu: 0.0.40
codegen_flags: <defaults>
</compile_context>

<pallas_src>
import jax
import jax.numpy as jnp
from jax.experimental import pallas as pl
from jax.experimental.pallas import tpu as pltpu

# ------------------------------------------------------------------ constants
symbols = list("_-!'(),.:;? abcdefghijklmnopqrstuvwxyz")  # synthetic symbol set
VOCAB = len(symbols)
K = 5          # conv kernel size
PAD = 2        # conv padding
OFF = 8        # sublane-aligned start row of the data region in the scratch
BN_EPS = 1e-5


def _round_up(x, m):
    return ((x + m - 1) // m) * m


def _device_kind():
    try:
        return jax.devices()[0].device_kind.lower()
    except Exception:
        return ""


# ------------------------------------------------------------------ kernel
def prenet_kernel(x_ref,
                  w1_ref, sh1_ref,
                  w2_ref, sh2_ref,
                  w3_ref, sh3_ref,
                  wp_ref, bp_ref,
                  out_ref,
                  hp_ref):
    """One grid step processes a (BB, T, E) block of embedded tokens."""
    BB, T, E = x_ref.shape

    # Zero only the conv halo rows; they are never dirtied by the kernel body
    # (which writes rows [OFF, OFF+T) only).  Done every step — each core has
    # its own scratch, so this must not be gated on program_id.
    hp_ref[:, OFF - PAD:OFF, :] = jnp.zeros((BB, PAD, E), hp_ref.dtype)
    hp_ref[:, OFF + T:OFF + T + PAD, :] = jnp.zeros((BB, PAD, E), hp_ref.dtype)

    # Stage the (bf16) input block into the padded scratch (aligned store).
    hp_ref[:, OFF:OFF + T, :] = x_ref[...].astype(hp_ref.dtype)

    def conv_bn_relu(w_ref, sh_ref):
        hp = hp_ref[...]                                          # (BB, Tp, E) bf16
        # im2col: K shifted views concatenated along the lane axis (bf16).
        x_cat = jnp.concatenate(
            [hp[:, OFF - PAD + k:OFF - PAD + k + T, :] for k in range(K)],
            axis=-1).reshape(BB * T, K * E)
        # Single MXU matmul per layer; conv bias + BN already folded in.
        y = jnp.dot(x_cat, w_ref[...],
                    preferred_element_type=jnp.float32)           # (BB*T, E) f32
        y = jnp.maximum(y + sh_ref[...], 0.0)                     # shift + ReLU (f32)
        hp_ref[:, OFF:OFF + T, :] = y.reshape(BB, T, E).astype(hp_ref.dtype)

    conv_bn_relu(w1_ref, sh1_ref)
    conv_bn_relu(w2_ref, sh2_ref)
    conv_bn_relu(w3_ref, sh3_ref)

    # Final linear projection (dropout in eval mode == identity).
    h = hp_ref[:, OFF:OFF + T, :].reshape(BB * T, E)
    out = jnp.dot(h, wp_ref[...], preferred_element_type=jnp.float32) \
        + bp_ref[...]
    out_ref[...] = out.reshape(BB, T, E).astype(out_ref.dtype)


# ------------------------------------------------------------------ param prep
def fold_prenet_params(params, compute_dtype=jnp.bfloat16):
    """One-time folding of conv bias + BatchNorm (eval) into im2col weights."""
    E = params["emb"].shape[1]
    folded = {"emb": params["emb"].astype(compute_dtype)}
    for i in (1, 2, 3):
        w_pt = params[f"conv{i}_w"]                               # (E_out, E_in, K)
        b_pt = params[f"conv{i}_b"]
        gamma, beta, mean, var = params[f"bn{i}"]
        scale = gamma / jnp.sqrt(var + BN_EPS)                    # (E,)
        # (E_out, E_in, K) -> (K, E_in, E_out) -> (K*E_in, E_out); fold scale.
        w = jnp.transpose(w_pt, (2, 1, 0)).reshape(K * E, E) * scale[None, :]
        folded[f"w{i}"] = w.astype(compute_dtype)
        folded[f"sh{i}"] = ((b_pt - mean) * scale + beta) \
            .reshape(1, E).astype(jnp.float32)
    folded["wp"] = params["proj_w"].T.astype(compute_dtype)       # (E, E)
    folded["bp"] = params["proj_b"].reshape(1, E).astype(jnp.float32)
    return folded


# ------------------------------------------------------------------ wrapper
def encoder_prenet_pallas(tokens, folded, *, compute_dtype=jnp.bfloat16,
                          out_dtype=jnp.float32, block_b=None):
    """tokens: (B, T) int32. folded: output of fold_prenet_params.
    Returns (B, T, E) out_dtype."""
    B, T = tokens.shape
    E = folded["emb"].shape[1]

    kind = _device_kind()
    is_v7 = ("v7" in kind) or ("tpu7" in kind)
    vmem_limit = (48 if is_v7 else 96) * 1024 * 1024

    # Embedding gather (XLA glue; padding_idx=0 row zeroed at init). bf16 feed.
    x_emb = folded["emb"][tokens]                                 # (B, T, E) bf16

    # ---- pick the batch block BB -------------------------------------------
    # Single-TC chips (v5e/v6e): maximize BB*T (amortize per-step overhead and
    # MXU push/pop).  v7x: keep >= 2 grid steps so both TensorCores get work.
    if block_b is None:
        target_m = 256 if is_v7 else 512
        target_b = max(1, target_m // max(T, 1))
        divisors = [d for d in range(1, B + 1) if B % d == 0]
        cands = [d for d in divisors if d <= target_b] or [1]
        block_b = max(cands)
        if is_v7:
            while block_b > 1 and B // block_b < 2:
                smaller = [d for d in divisors if d < block_b]
                block_b = max(smaller) if smaller else 1
    BB = block_b
    assert B % BB == 0
    grid = (B // BB,)

    # Sublane-aligned padded time extent for the scratch buffer.
    Tp = _round_up(OFF + T + PAD, 8)

    ins = [x_emb,
           folded["w1"], folded["sh1"],
           folded["w2"], folded["sh2"],
           folded["w3"], folded["sh3"],
           folded["wp"], folded["bp"]]

    cost = pl.CostEstimate(
        flops=2 * B * T * (3 * K * E * E + E * E),
        transcendentals=0,
        bytes_accessed=(B * T * E * (x_emb.dtype.itemsize
                                     + jnp.dtype(out_dtype).itemsize)
                        + (3 * K * E * E + E * E) * 2 + 8 * E))

    def build(single_buffer_weights):
        def wspec(shape):
            if single_buffer_weights:
                return pl.BlockSpec(shape, lambda b: (0,) * len(shape),
                                    pipeline_mode=pl.Buffered(1))
            return pl.BlockSpec(shape, lambda b: (0,) * len(shape))

        in_specs = [pl.BlockSpec((BB, T, E), lambda b: (b, 0, 0))]
        for _ in range(3):
            in_specs += [wspec((K * E, E)),
                         pl.BlockSpec((1, E), lambda b: (0, 0))]
        in_specs += [wspec((E, E)),
                     pl.BlockSpec((1, E), lambda b: (0, 0))]

        return pl.pallas_call(
            prenet_kernel,
            out_shape=jax.ShapeDtypeStruct((B, T, E), out_dtype),
            grid_spec=pltpu.PrefetchScalarGridSpec(
                num_scalar_prefetch=0,
                grid=grid,
                in_specs=in_specs,
                out_specs=pl.BlockSpec((BB, T, E), lambda b: (b, 0, 0)),
                scratch_shapes=[pltpu.VMEM((BB, Tp, E), compute_dtype)],
            ),
            compiler_params=pltpu.CompilerParams(
                dimension_semantics=("parallel",),
                vmem_limit_bytes=vmem_limit),
            cost_estimate=cost,
        )

    try:
        return build(True)(*ins)
    except Exception:
        # Fall back to default (double-buffered) weight pipelining if this
        # JAX build rejects single-buffered BlockSpecs.
        return build(False)(*ins)


# ------------------------------------------------------------------ reference
def encoder_prenet_reference(tokens, params):
    x = params["emb"][tokens]                                     # (B, T, E)
    h = jnp.transpose(x, (0, 2, 1))                               # (B, E, T) NCL
    for i in (1, 2, 3):
        w = params[f"conv{i}_w"]                                  # (E_out, E_in, K)
        b = params[f"conv{i}_b"]
        h = jax.lax.conv_general_dilated(
            h, w, window_strides=(1,), padding=[(PAD, PAD)],
            dimension_numbers=("NCH", "OIH", "NCH"))
        h = h + b[None, :, None]
        gamma, beta, mean, var = params[f"bn{i}"]
        h = (h - mean[None, :, None]) / jnp.sqrt(var[None, :, None] + BN_EPS)
        h = h * gamma[None, :, None] + beta[None, :, None]
        h = jnp.maximum(h, 0.0)
    h = jnp.transpose(h, (0, 2, 1))                               # (B, T, E)
    return h @ params["proj_w"].T + params["proj_b"]


# ------------------------------------------------------------------ params
def init_params(key, embedding_size):
    E = embedding_size
    params = {}
    emb = 0.1 * jax.random.normal(jax.random.fold_in(key, 0), (VOCAB, E),
                                  jnp.float32)
    params["emb"] = emb.at[0].set(0.0)                            # padding_idx=0
    for i in (1, 2, 3):
        params[f"conv{i}_w"] = 0.1 * jax.random.normal(
            jax.random.fold_in(key, 10 * i + 0), (E, E, K), jnp.float32)
        params[f"conv{i}_b"] = 0.05 * jax.random.normal(
            jax.random.fold_in(key, 10 * i + 1), (E,), jnp.float32)
        gamma = 1.0 + 0.1 * jax.random.normal(
            jax.random.fold_in(key, 10 * i + 2), (E,), jnp.float32)
        beta = 0.1 * jax.random.normal(
            jax.random.fold_in(key, 10 * i + 3), (E,), jnp.float32)
        mean = 0.1 * jax.random.normal(
            jax.random.fold_in(key, 10 * i + 4), (E,), jnp.float32)
        var = 0.5 + jnp.abs(0.3 * jax.random.normal(
            jax.random.fold_in(key, 10 * i + 5), (E,), jnp.float32))
        params[f"bn{i}"] = (gamma, beta, mean, var)
    params["proj_w"] = 0.1 * jax.random.normal(
        jax.random.fold_in(key, 300), (E, E), jnp.float32)
    params["proj_b"] = 0.05 * jax.random.normal(
        jax.random.fold_in(key, 301), (E,), jnp.float32)
    return params


# ------------------------------------------------------------------ main
if __name__ == "__main__":
    B, T, E = 2, 16, 32
    key = jax.random.PRNGKey(0)
    params = init_params(key, E)
    tokens = jax.random.randint(jax.random.fold_in(key, 7), (B, T), 0, VOCAB,
                                jnp.int32)

    folded = fold_prenet_params(params)        # one-time fold (hoisted)
    out = encoder_prenet_pallas(tokens, folded)
    out = jax.block_until_ready(out)

    ref = encoder_prenet_reference(tokens, params)
    assert out.shape == (B, T, E)
    max_err = float(jnp.max(jnp.abs(out - ref)))
    # bf16 matmul operands and bf16 inter-layer activations -> loose tolerance.
    assert jnp.allclose(out, ref, atol=3e-2, rtol=3e-2), \
        f"max abs err {max_err}"
    print("KERNEL_OK")
</pallas_src>

<mosaic_0001>
module attributes {stable_mosaic.version = 11 : i64} {
  func.func @prenet_kernel(%arg0: i32, %arg1: memref<2x16x32xbf16, #tpu.memory_space<vmem>>, %arg2: memref<160x32xbf16, #tpu.memory_space<vmem>>, %arg3: memref<1x32xf32, #tpu.memory_space<vmem>>, %arg4: memref<160x32xbf16, #tpu.memory_space<vmem>>, %arg5: memref<1x32xf32, #tpu.memory_space<vmem>>, %arg6: memref<160x32xbf16, #tpu.memory_space<vmem>>, %arg7: memref<1x32xf32, #tpu.memory_space<vmem>>, %arg8: memref<32x32xbf16, #tpu.memory_space<vmem>>, %arg9: memref<1x32xf32, #tpu.memory_space<vmem>>, %arg10: memref<2x16x32xf32, #tpu.memory_space<vmem>>, %arg11: memref<2x32x32xbf16, #tpu.memory_space<vmem>>) attributes {dimension_semantics = [#tpu.dimension_semantics<parallel>], iteration_bounds = array<i64: 1>, scalar_prefetch = 0 : i64, scratch_operands = 1 : i64, tpu.core_type = #tpu.core_type<tc>, window_params = [{transform_indices = @transform_0, window_bounds = array<i64: 2, 16, 32>}, {pipeline_mode = #tpu.pipeline_mode<synchronous>, transform_indices = @transform_1, window_bounds = array<i64: 160, 32>}, {pipeline_mode = #tpu.pipeline_mode<synchronous>, transform_indices = @transform_2, window_bounds = array<i64: 1, 32>}, {pipeline_mode = #tpu.pipeline_mode<synchronous>, transform_indices = @transform_3, window_bounds = array<i64: 160, 32>}, {pipeline_mode = #tpu.pipeline_mode<synchronous>, transform_indices = @transform_4, window_bounds = array<i64: 1, 32>}, {pipeline_mode = #tpu.pipeline_mode<synchronous>, transform_indices = @transform_5, window_bounds = array<i64: 160, 32>}, {pipeline_mode = #tpu.pipeline_mode<synchronous>, transform_indices = @transform_6, window_bounds = array<i64: 1, 32>}, {pipeline_mode = #tpu.pipeline_mode<synchronous>, transform_indices = @transform_7, window_bounds = array<i64: 32, 32>}, {pipeline_mode = #tpu.pipeline_mode<synchronous>, transform_indices = @transform_8, window_bounds = array<i64: 1, 32>}, {transform_indices = @transform_9, window_bounds = array<i64: 2, 16, 32>}]} {
    %cst = arith.constant 0.000000e+00 : bf16
    %0 = vector.broadcast %cst : bf16 to vector<2x2x32xbf16>
    %c0 = arith.constant 0 : index
    %c6 = arith.constant 6 : index
    %c0_0 = arith.constant 0 : index
    %1 = vector.load %arg11[%c0, %c6, %c0_0] : memref<2x32x32xbf16, #tpu.memory_space<vmem>>, vector<2x2x32xbf16>
    tpu.vector_store %arg11[%c0, %c6, %c0_0], %0 {strides = array<i32>} : memref<2x32x32xbf16, #tpu.memory_space<vmem>>, vector<2x2x32xbf16>,
    %cst_1 = arith.constant 0.000000e+00 : bf16
    %2 = vector.broadcast %cst_1 : bf16 to vector<2x2x32xbf16>
    %c0_2 = arith.constant 0 : index
    %c24 = arith.constant 24 : index
    %c0_3 = arith.constant 0 : index
    %3 = vector.load %arg11[%c0_2, %c24, %c0_3] : memref<2x32x32xbf16, #tpu.memory_space<vmem>>, vector<2x2x32xbf16>
    tpu.vector_store %arg11[%c0_2, %c24, %c0_3], %2 {strides = array<i32>} : memref<2x32x32xbf16, #tpu.memory_space<vmem>>, vector<2x2x32xbf16>,
    %c0_4 = arith.constant 0 : index
    %c0_5 = arith.constant 0 : index
    %c0_6 = arith.constant 0 : index
    %4 = vector.load %arg1[%c0_4, %c0_5, %c0_6] : memref<2x16x32xbf16, #tpu.memory_space<vmem>>, vector<2x16x32xbf16>
    %c0_7 = arith.constant 0 : index
    %c8 = arith.constant 8 : index
    %c0_8 = arith.constant 0 : index
    %5 = vector.load %arg11[%c0_7, %c8, %c0_8] : memref<2x32x32xbf16, #tpu.memory_space<vmem>>, vector<2x16x32xbf16>
    tpu.vector_store %arg11[%c0_7, %c8, %c0_8], %4 {strides = array<i32>} : memref<2x32x32xbf16, #tpu.memory_space<vmem>>, vector<2x16x32xbf16>,
    %c0_9 = arith.constant 0 : index
    %c0_10 = arith.constant 0 : index
    %c0_11 = arith.constant 0 : index
    %6 = vector.load %arg11[%c0_9, %c0_10, %c0_11] : memref<2x32x32xbf16, #tpu.memory_space<vmem>>, vector<2x32x32xbf16>
    %7 = vector.extract_strided_slice %6 {offsets = [0, 6, 0], sizes = [2, 16, 32], strides = [1, 1, 1]} : vector<2x32x32xbf16> to vector<2x16x32xbf16>
    %8 = vector.extract_strided_slice %6 {offsets = [0, 7, 0], sizes = [2, 16, 32], strides = [1, 1, 1]} : vector<2x32x32xbf16> to vector<2x16x32xbf16>
    %9 = vector.extract_strided_slice %6 {offsets = [0, 8, 0], sizes = [2, 16, 32], strides = [1, 1, 1]} : vector<2x32x32xbf16> to vector<2x16x32xbf16>
    %10 = vector.extract_strided_slice %6 {offsets = [0, 9, 0], sizes = [2, 16, 32], strides = [1, 1, 1]} : vector<2x32x32xbf16> to vector<2x16x32xbf16>
    %11 = vector.extract_strided_slice %6 {offsets = [0, 10, 0], sizes = [2, 16, 32], strides = [1, 1, 1]} : vector<2x32x32xbf16> to vector<2x16x32xbf16>
    %12 = tpu.concatenate %7, %8, %9, %10, %11 in 2 : vector<2x16x32xbf16>, vector<2x16x32xbf16>, vector<2x16x32xbf16>, vector<2x16x32xbf16>, vector<2x16x32xbf16> -> vector<2x16x160xbf16>
    %13 = vector.shape_cast %12 : vector<2x16x160xbf16> to vector<32x160xbf16>
    %c0_12 = arith.constant 0 : index
    %c0_13 = arith.constant 0 : index
    %14 = vector.load %arg2[%c0_12, %c0_13] : memref<160x32xbf16, #tpu.memory_space<vmem>>, vector<160x32xbf16>
    %cst_14 = arith.constant dense<0.000000e+00> : vector<32x32xf32>
    %15 = tpu.matmul %13, %14, %cst_14 {dimension_numbers = #tpu.dot_dimension_numbers<[1], [0], [0], [1], [0, 0, 1, 1], [], []>} : vector<32x160xbf16>, vector<160x32xbf16>, vector<32x32xf32> -> vector<32x32xf32>
    %c0_15 = arith.constant 0 : index
    %c0_16 = arith.constant 0 : index
    %16 = vector.load %arg3[%c0_15, %c0_16] : memref<1x32xf32, #tpu.memory_space<vmem>>, vector<1x32xf32>
    %17 = vector.broadcast %16 : vector<1x32xf32> to vector<32x32xf32>
    %18 = arith.addf %15, %17 : vector<32x32xf32>
    %cst_17 = arith.constant 0.000000e+00 : f32
    %19 = vector.broadcast %cst_17 : f32 to vector<32x32xf32>
    %20 = arith.maximumf %18, %19 : vector<32x32xf32>
    %21 = vector.shape_cast %20 : vector<32x32xf32> to vector<2x16x32xf32>
    %22 = arith.truncf %21 : vector<2x16x32xf32> to vector<2x16x32xbf16>
    %c0_18 = arith.constant 0 : index
    %c8_19 = arith.constant 8 : index
    %c0_20 = arith.constant 0 : index
    %23 = vector.load %arg11[%c0_18, %c8_19, %c0_20] : memref<2x32x32xbf16, #tpu.memory_space<vmem>>, vector<2x16x32xbf16>
    tpu.vector_store %arg11[%c0_18, %c8_19, %c0_20], %22 {strides = array<i32>} : memref<2x32x32xbf16, #tpu.memory_space<vmem>>, vector<2x16x32xbf16>,
    %c0_21 = arith.constant 0 : index
    %c0_22 = arith.constant 0 : index
    %c0_23 = arith.constant 0 : index
    %24 = vector.load %arg11[%c0_21, %c0_22, %c0_23] : memref<2x32x32xbf16, #tpu.memory_space<vmem>>, vector<2x32x32xbf16>
    %25 = vector.extract_strided_slice %24 {offsets = [0, 6, 0], sizes = [2, 16, 32], strides = [1, 1, 1]} : vector<2x32x32xbf16> to vector<2x16x32xbf16>
    %26 = vector.extract_strided_slice %24 {offsets = [0, 7, 0], sizes = [2, 16, 32], strides = [1, 1, 1]} : vector<2x32x32xbf16> to vector<2x16x32xbf16>
    %27 = vector.extract_strided_slice %24 {offsets = [0, 8, 0], sizes = [2, 16, 32], strides = [1, 1, 1]} : vector<2x32x32xbf16> to vector<2x16x32xbf16>
    %28 = vector.extract_strided_slice %24 {offsets = [0, 9, 0], sizes = [2, 16, 32], strides = [1, 1, 1]} : vector<2x32x32xbf16> to vector<2x16x32xbf16>
    %29 = vector.extract_strided_slice %24 {offsets = [0, 10, 0], sizes = [2, 16, 32], strides = [1, 1, 1]} : vector<2x32x32xbf16> to vector<2x16x32xbf16>
    %30 = tpu.concatenate %25, %26, %27, %28, %29 in 2 : vector<2x16x32xbf16>, vector<2x16x32xbf16>, vector<2x16x32xbf16>, vector<2x16x32xbf16>, vector<2x16x32xbf16> -> vector<2x16x160xbf16>
    %31 = vector.shape_cast %30 : vector<2x16x160xbf16> to vector<32x160xbf16>
    %c0_24 = arith.constant 0 : index
    %c0_25 = arith.constant 0 : index
    %32 = vector.load %arg4[%c0_24, %c0_25] : memref<160x32xbf16, #tpu.memory_space<vmem>>, vector<160x32xbf16>
    %cst_26 = arith.constant dense<0.000000e+00> : vector<32x32xf32>
    %33 = tpu.matmul %31, %32, %cst_26 {dimension_numbers = #tpu.dot_dimension_numbers<[1], [0], [0], [1], [0, 0, 1, 1], [], []>} : vector<32x160xbf16>, vector<160x32xbf16>, vector<32x32xf32> -> vector<32x32xf32>
    %c0_27 = arith.constant 0 : index
    %c0_28 = arith.constant 0 : index
    %34 = vector.load %arg5[%c0_27, %c0_28] : memref<1x32xf32, #tpu.memory_space<vmem>>, vector<1x32xf32>
    %35 = vector.broadcast %34 : vector<1x32xf32> to vector<32x32xf32>
    %36 = arith.addf %33, %35 : vector<32x32xf32>
    %cst_29 = arith.constant 0.000000e+00 : f32
    %37 = vector.broadcast %cst_29 : f32 to vector<32x32xf32>
    %38 = arith.maximumf %36, %37 : vector<32x32xf32>
    %39 = vector.shape_cast %38 : vector<32x32xf32> to vector<2x16x32xf32>
    %40 = arith.truncf %39 : vector<2x16x32xf32> to vector<2x16x32xbf16>
    %c0_30 = arith.constant 0 : index
    %c8_31 = arith.constant 8 : index
    %c0_32 = arith.constant 0 : index
    %41 = vector.load %arg11[%c0_30, %c8_31, %c0_32] : memref<2x32x32xbf16, #tpu.memory_space<vmem>>, vector<2x16x32xbf16>
    tpu.vector_store %arg11[%c0_30, %c8_31, %c0_32], %40 {strides = array<i32>} : memref<2x32x32xbf16, #tpu.memory_space<vmem>>, vector<2x16x32xbf16>,
    %c0_33 = arith.constant 0 : index
    %c0_34 = arith.constant 0 : index
    %c0_35 = arith.constant 0 : index
    %42 = vector.load %arg11[%c0_33, %c0_34, %c0_35] : memref<2x32x32xbf16, #tpu.memory_space<vmem>>, vector<2x32x32xbf16>
    %43 = vector.extract_strided_slice %42 {offsets = [0, 6, 0], sizes = [2, 16, 32], strides = [1, 1, 1]} : vector<2x32x32xbf16> to vector<2x16x32xbf16>
    %44 = vector.extract_strided_slice %42 {offsets = [0, 7, 0], sizes = [2, 16, 32], strides = [1, 1, 1]} : vector<2x32x32xbf16> to vector<2x16x32xbf16>
    %45 = vector.extract_strided_slice %42 {offsets = [0, 8, 0], sizes = [2, 16, 32], strides = [1, 1, 1]} : vector<2x32x32xbf16> to vector<2x16x32xbf16>
    %46 = vector.extract_strided_slice %42 {offsets = [0, 9, 0], sizes = [2, 16, 32], strides = [1, 1, 1]} : vector<2x32x32xbf16> to vector<2x16x32xbf16>
    %47 = vector.extract_strided_slice %42 {offsets = [0, 10, 0], sizes = [2, 16, 32], strides = [1, 1, 1]} : vector<2x32x32xbf16> to vector<2x16x32xbf16>
    %48 = tpu.concatenate %43, %44, %45, %46, %47 in 2 : vector<2x16x32xbf16>, vector<2x16x32xbf16>, vector<2x16x32xbf16>, vector<2x16x32xbf16>, vector<2x16x32xbf16> -> vector<2x16x160xbf16>
    %49 = vector.shape_cast %48 : vector<2x16x160xbf16> to vector<32x160xbf16>
    %c0_36 = arith.constant 0 : index
    %c0_37 = arith.constant 0 : index
    %50 = vector.load %arg6[%c0_36, %c0_37] : memref<160x32xbf16, #tpu.memory_space<vmem>>, vector<160x32xbf16>
    %cst_38 = arith.constant dense<0.000000e+00> : vector<32x32xf32>
    %51 = tpu.matmul %49, %50, %cst_38 {dimension_numbers = #tpu.dot_dimension_numbers<[1], [0], [0], [1], [0, 0, 1, 1], [], []>} : vector<32x160xbf16>, vector<160x32xbf16>, vector<32x32xf32> -> vector<32x32xf32>
    %c0_39 = arith.constant 0 : index
    %c0_40 = arith.constant 0 : index
    %52 = vector.load %arg7[%c0_39, %c0_40] : memref<1x32xf32, #tpu.memory_space<vmem>>, vector<1x32xf32>
    %53 = vector.broadcast %52 : vector<1x32xf32> to vector<32x32xf32>
    %54 = arith.addf %51, %53 : vector<32x32xf32>
    %cst_41 = arith.constant 0.000000e+00 : f32
    %55 = vector.broadcast %cst_41 : f32 to vector<32x32xf32>
    %56 = arith.maximumf %54, %55 : vector<32x32xf32>
    %57 = vector.shape_cast %56 : vector<32x32xf32> to vector<2x16x32xf32>
    %58 = arith.truncf %57 : vector<2x16x32xf32> to vector<2x16x32xbf16>
    %c0_42 = arith.constant 0 : index
    %c8_43 = arith.constant 8 : index
    %c0_44 = arith.constant 0 : index
    %59 = vector.load %arg11[%c0_42, %c8_43, %c0_44] : memref<2x32x32xbf16, #tpu.memory_space<vmem>>, vector<2x16x32xbf16>
    tpu.vector_store %arg11[%c0_42, %c8_43, %c0_44], %58 {strides = array<i32>} : memref<2x32x32xbf16, #tpu.memory_space<vmem>>, vector<2x16x32xbf16>,
    %c0_45 = arith.constant 0 : index
    %c8_46 = arith.constant 8 : index
    %c0_47 = arith.constant 0 : index
    %60 = vector.load %arg11[%c0_45, %c8_46, %c0_47] : memref<2x32x32xbf16, #tpu.memory_space<vmem>>, vector<2x16x32xbf16>
    %61 = vector.shape_cast %60 : vector<2x16x32xbf16> to vector<32x32xbf16>
    %c0_48 = arith.constant 0 : index
    %c0_49 = arith.constant 0 : index
    %62 = vector.load %arg8[%c0_48, %c0_49] : memref<32x32xbf16, #tpu.memory_space<vmem>>, vector<32x32xbf16>
    %cst_50 = arith.constant dense<0.000000e+00> : vector<32x32xf32>
    %63 = tpu.matmul %61, %62, %cst_50 {dimension_numbers = #tpu.dot_dimension_numbers<[1], [0], [0], [1], [0, 0, 1, 1], [], []>} : vector<32x32xbf16>, vector<32x32xbf16>, vector<32x32xf32> -> vector<32x32xf32>
    %c0_51 = arith.constant 0 : index
    %c0_52 = arith.constant 0 : index
    %64 = vector.load %arg9[%c0_51, %c0_52] : memref<1x32xf32, #tpu.memory_space<vmem>>, vector<1x32xf32>
    %65 = vector.broadcast %64 : vector<1x32xf32> to vector<32x32xf32>
    %66 = arith.addf %63, %65 : vector<32x32xf32>
    %67 = vector.shape_cast %66 : vector<32x32xf32> to vector<2x16x32xf32>
    %c0_53 = arith.constant 0 : index
    %c0_54 = arith.constant 0 : index
    %c0_55 = arith.constant 0 : index
    %68 = vector.load %arg10[%c0_53, %c0_54, %c0_55] : memref<2x16x32xf32, #tpu.memory_space<vmem>>, vector<2x16x32xf32>
    tpu.vector_store %arg10[%c0_53, %c0_54, %c0_55], %67 {strides = array<i32>} : memref<2x16x32xf32, #tpu.memory_space<vmem>>, vector<2x16x32xf32>,
    return
  }
  func.func @transform_0(%arg0: i32) -> (i32, i32, i32) {
    %c0_i32 = arith.constant 0 : i32
    %c0_i32_0 = arith.constant 0 : i32
    %c0_i32_1 = arith.constant 0 : i32
    return %arg0, %c0_i32, %c0_i32_0 : i32, i32, i32
  }
  func.func @transform_1(%arg0: i32) -> (i32, i32) {
    %c0_i32 = arith.constant 0 : i32
    %c0_i32_0 = arith.constant 0 : i32
    %c0_i32_1 = arith.constant 0 : i32
    return %c0_i32, %c0_i32_0 : i32, i32
  }
  func.func @transform_2(%arg0: i32) -> (i32, i32) {
    %c0_i32 = arith.constant 0 : i32
    %c0_i32_0 = arith.constant 0 : i32
    %c0_i32_1 = arith.constant 0 : i32
    return %c0_i32, %c0_i32_0 : i32, i32
  }
  func.func @transform_3(%arg0: i32) -> (i32, i32) {
    %c0_i32 = arith.constant 0 : i32
    %c0_i32_0 = arith.constant 0 : i32
    %c0_i32_1 = arith.constant 0 : i32
    return %c0_i32, %c0_i32_0 : i32, i32
  }
  func.func @transform_4(%arg0: i32) -> (i32, i32) {
    %c0_i32 = arith.constant 0 : i32
    %c0_i32_0 = arith.constant 0 : i32
    %c0_i32_1 = arith.constant 0 : i32
    return %c0_i32, %c0_i32_0 : i32, i32
  }
  func.func @transform_5(%arg0: i32) -> (i32, i32) {
    %c0_i32 = arith.constant 0 : i32
    %c0_i32_0 = arith.constant 0 : i32
    %c0_i32_1 = arith.constant 0 : i32
    return %c0_i32, %c0_i32_0 : i32, i32
  }
  func.func @transform_6(%arg0: i32) -> (i32, i32) {
    %c0_i32 = arith.constant 0 : i32
    %c0_i32_0 = arith.constant 0 : i32
    %c0_i32_1 = arith.constant 0 : i32
    return %c0_i32, %c0_i32_0 : i32, i32
  }
  func.func @transform_7(%arg0: i32) -> (i32, i32) {
    %c0_i32 = arith.constant 0 : i32
    %c0_i32_0 = arith.constant 0 : i32
    %c0_i32_1 = arith.constant 0 : i32
    return %c0_i32, %c0_i32_0 : i32, i32
  }
  func.func @transform_8(%arg0: i32) -> (i32, i32) {
    %c0_i32 = arith.constant 0 : i32
    %c0_i32_0 = arith.constant 0 : i32
    %c0_i32_1 = arith.constant 0 : i32
    return %c0_i32, %c0_i32_0 : i32, i32
  }
  func.func @transform_9(%arg0: i32) -> (i32, i32, i32) {
    %c0_i32 = arith.constant 0 : i32
    %c0_i32_0 = arith.constant 0 : i32
    %c0_i32_1 = arith.constant 0 : i32
    return %arg0, %c0_i32, %c0_i32_0 : i32, i32, i32
  }
}

module attributes {stable_mosaic.version = 11 : i64} {
  func.func @prenet_kernel(%arg0: i32, %arg1: memref<2x16x32xbf16, #tpu.memory_space<vmem>>, %arg2: memref<160x32xbf16, #tpu.memory_space<vmem>>, %arg3: memref<1x32xf32, #tpu.memory_space<vmem>>, %arg4: memref<160x32xbf16, #tpu.memory_space<vmem>>, %arg5: memref<1x32xf32, #tpu.memory_space<vmem>>, %arg6: memref<160x32xbf16, #tpu.memory_space<vmem>>, %arg7: memref<1x32xf32, #tpu.memory_space<vmem>>, %arg8: memref<32x32xbf16, #tpu.memory_space<vmem>>, %arg9: memref<1x32xf32, #tpu.memory_space<vmem>>, %arg10: memref<2x16x32xf32, #tpu.memory_space<vmem>>, %arg11: memref<2x32x32xbf16, #tpu.memory_space<vmem>>) attributes {dimension_semantics = [#tpu.dimension_semantics<parallel>], iteration_bounds = array<i64: 1>, scalar_prefetch = 0 : i64, scratch_operands = 1 : i64, tpu.core_type = #tpu.core_type<tc>, window_params = [{transform_indices = @transform_0, window_bounds = array<i64: 2, 16, 32>}, {pipeline_mode = #tpu.pipeline_mode<synchronous>, transform_indices = @transform_1, window_bounds = array<i64: 160, 32>}, {pipeline_mode = #tpu.pipeline_mode<synchronous>, transform_indices = @transform_2, window_bounds = array<i64: 1, 32>}, {pipeline_mode = #tpu.pipeline_mode<synchronous>, transform_indices = @transform_3, window_bounds = array<i64: 160, 32>}, {pipeline_mode = #tpu.pipeline_mode<synchronous>, transform_indices = @transform_4, window_bounds = array<i64: 1, 32>}, {pipeline_mode = #tpu.pipeline_mode<synchronous>, transform_indices = @transform_5, window_bounds = array<i64: 160, 32>}, {pipeline_mode = #tpu.pipeline_mode<synchronous>, transform_indices = @transform_6, window_bounds = array<i64: 1, 32>}, {pipeline_mode = #tpu.pipeline_mode<synchronous>, transform_indices = @transform_7, window_bounds = array<i64: 32, 32>}, {pipeline_mode = #tpu.pipeline_mode<synchronous>, transform_indices = @transform_8, window_bounds = array<i64: 1, 32>}, {transform_indices = @transform_9, window_bounds = array<i64: 2, 16, 32>}]} {
    %cst = arith.constant 0.000000e+00 : bf16
    %0 = vector.broadcast %cst : bf16 to vector<2x2x32xbf16>
    %c0 = arith.constant 0 : index
    %c6 = arith.constant 6 : index
    %c0_0 = arith.constant 0 : index
    %1 = vector.load %arg11[%c0, %c6, %c0_0] : memref<2x32x32xbf16, #tpu.memory_space<vmem>>, vector<2x2x32xbf16>
    tpu.vector_store %arg11[%c0, %c6, %c0_0], %0 {strides = array<i32>} : memref<2x32x32xbf16, #tpu.memory_space<vmem>>, vector<2x2x32xbf16>,
    %cst_1 = arith.constant 0.000000e+00 : bf16
    %2 = vector.broadcast %cst_1 : bf16 to vector<2x2x32xbf16>
    %c0_2 = arith.constant 0 : index
    %c24 = arith.constant 24 : index
    %c0_3 = arith.constant 0 : index
    %3 = vector.load %arg11[%c0_2, %c24, %c0_3] : memref<2x32x32xbf16, #tpu.memory_space<vmem>>, vector<2x2x32xbf16>
    tpu.vector_store %arg11[%c0_2, %c24, %c0_3], %2 {strides = array<i32>} : memref<2x32x32xbf16, #tpu.memory_space<vmem>>, vector<2x2x32xbf16>,
    %c0_4 = arith.constant 0 : index
    %c0_5 = arith.constant 0 : index
    %c0_6 = arith.constant 0 : index
    %4 = vector.load %arg1[%c0_4, %c0_5, %c0_6] : memref<2x16x32xbf16, #tpu.memory_space<vmem>>, vector<2x16x32xbf16>
    %c0_7 = arith.constant 0 : index
    %c8 = arith.constant 8 : index
    %c0_8 = arith.constant 0 : index
    %5 = vector.load %arg11[%c0_7, %c8, %c0_8] : memref<2x32x32xbf16, #tpu.memory_space<vmem>>, vector<2x16x32xbf16>
    tpu.vector_store %arg11[%c0_7, %c8, %c0_8], %4 {strides = array<i32>} : memref<2x32x32xbf16, #tpu.memory_space<vmem>>, vector<2x16x32xbf16>,
    %c0_9 = arith.constant 0 : index
    %c0_10 = arith.constant 0 : index
    %c0_11 = arith.constant 0 : index
    %6 = vector.load %arg11[%c0_9, %c0_10, %c0_11] : memref<2x32x32xbf16, #tpu.memory_space<vmem>>, vector<2x32x32xbf16>
    %7 = vector.extract_strided_slice %6 {offsets = [0, 6, 0], sizes = [2, 16, 32], strides = [1, 1, 1]} : vector<2x32x32xbf16> to vector<2x16x32xbf16>
    %8 = vector.extract_strided_slice %6 {offsets = [0, 7, 0], sizes = [2, 16, 32], strides = [1, 1, 1]} : vector<2x32x32xbf16> to vector<2x16x32xbf16>
    %9 = vector.extract_strided_slice %6 {offsets = [0, 8, 0], sizes = [2, 16, 32], strides = [1, 1, 1]} : vector<2x32x32xbf16> to vector<2x16x32xbf16>
    %10 = vector.extract_strided_slice %6 {offsets = [0, 9, 0], sizes = [2, 16, 32], strides = [1, 1, 1]} : vector<2x32x32xbf16> to vector<2x16x32xbf16>
    %11 = vector.extract_strided_slice %6 {offsets = [0, 10, 0], sizes = [2, 16, 32], strides = [1, 1, 1]} : vector<2x32x32xbf16> to vector<2x16x32xbf16>
    %12 = tpu.concatenate %7, %8, %9, %10, %11 in 2 : vector<2x16x32xbf16>, vector<2x16x32xbf16>, vector<2x16x32xbf16>, vector<2x16x32xbf16>, vector<2x16x32xbf16> -> vector<2x16x160xbf16>
    %13 = vector.shape_cast %12 : vector<2x16x160xbf16> to vector<32x160xbf16>
    %c0_12 = arith.constant 0 : index
    %c0_13 = arith.constant 0 : index
    %14 = vector.load %arg2[%c0_12, %c0_13] : memref<160x32xbf16, #tpu.memory_space<vmem>>, vector<160x32xbf16>
    %cst_14 = arith.constant dense<0.000000e+00> : vector<32x32xf32>
    %15 = tpu.matmul %13, %14, %cst_14 {dimension_numbers = #tpu.dot_dimension_numbers<[1], [0], [0], [1], [0, 0, 1, 1], [], []>} : vector<32x160xbf16>, vector<160x32xbf16>, vector<32x32xf32> -> vector<32x32xf32>
    %c0_15 = arith.constant 0 : index
    %c0_16 = arith.constant 0 : index
    %16 = vector.load %arg3[%c0_15, %c0_16] : memref<1x32xf32, #tpu.memory_space<vmem>>, vector<1x32xf32>
    %17 = vector.broadcast %16 : vector<1x32xf32> to vector<32x32xf32>
    %18 = arith.addf %15, %17 : vector<32x32xf32>
    %cst_17 = arith.constant 0.000000e+00 : f32
    %19 = vector.broadcast %cst_17 : f32 to vector<32x32xf32>
    %20 = arith.maximumf %18, %19 : vector<32x32xf32>
    %21 = vector.shape_cast %20 : vector<32x32xf32> to vector<2x16x32xf32>
    %22 = arith.truncf %21 : vector<2x16x32xf32> to vector<2x16x32xbf16>
    %c0_18 = arith.constant 0 : index
    %c8_19 = arith.constant 8 : index
    %c0_20 = arith.constant 0 : index
    %23 = vector.load %arg11[%c0_18, %c8_19, %c0_20] : memref<2x32x32xbf16, #tpu.memory_space<vmem>>, vector<2x16x32xbf16>
    tpu.vector_store %arg11[%c0_18, %c8_19, %c0_20], %22 {strides = array<i32>} : memref<2x32x32xbf16, #tpu.memory_space<vmem>>, vector<2x16x32xbf16>,
    %c0_21 = arith.constant 0 : index
    %c0_22 = arith.constant 0 : index
    %c0_23 = arith.constant 0 : index
    %24 = vector.load %arg11[%c0_21, %c0_22, %c0_23] : memref<2x32x32xbf16, #tpu.memory_space<vmem>>, vector<2x32x32xbf16>
    %25 = vector.extract_strided_slice %24 {offsets = [0, 6, 0], sizes = [2, 16, 32], strides = [1, 1, 1]} : vector<2x32x32xbf16> to vector<2x16x32xbf16>
    %26 = vector.extract_strided_slice %24 {offsets = [0, 7, 0], sizes = [2, 16, 32], strides = [1, 1, 1]} : vector<2x32x32xbf16> to vector<2x16x32xbf16>
    %27 = vector.extract_strided_slice %24 {offsets = [0, 8, 0], sizes = [2, 16, 32], strides = [1, 1, 1]} : vector<2x32x32xbf16> to vector<2x16x32xbf16>
    %28 = vector.extract_strided_slice %24 {offsets = [0, 9, 0], sizes = [2, 16, 32], strides = [1, 1, 1]} : vector<2x32x32xbf16> to vector<2x16x32xbf16>
    %29 = vector.extract_strided_slice %24 {offsets = [0, 10, 0], sizes = [2, 16, 32], strides = [1, 1, 1]} : vector<2x32x32xbf16> to vector<2x16x32xbf16>
    %30 = tpu.concatenate %25, %26, %27, %28, %29 in 2 : vector<2x16x32xbf16>, vector<2x16x32xbf16>, vector<2x16x32xbf16>, vector<2x16x32xbf16>, vector<2x16x32xbf16> -> vector<2x16x160xbf16>
    %31 = vector.shape_cast %30 : vector<2x16x160xbf16> to vector<32x160xbf16>
    %c0_24 = arith.constant 0 : index
    %c0_25 = arith.constant 0 : index
    %32 = vector.load %arg4[%c0_24, %c0_25] : memref<160x32xbf16, #tpu.memory_space<vmem>>, vector<160x32xbf16>
    %cst_26 = arith.constant dense<0.000000e+00> : vector<32x32xf32>
    %33 = tpu.matmul %31, %32, %cst_26 {dimension_numbers = #tpu.dot_dimension_numbers<[1], [0], [0], [1], [0, 0, 1, 1], [], []>} : vector<32x160xbf16>, vector<160x32xbf16>, vector<32x32xf32> -> vector<32x32xf32>
    %c0_27 = arith.constant 0 : index
    %c0_28 = arith.constant 0 : index
    %34 = vector.load %arg5[%c0_27, %c0_28] : memref<1x32xf32, #tpu.memory_space<vmem>>, vector<1x32xf32>
    %35 = vector.broadcast %34 : vector<1x32xf32> to vector<32x32xf32>
    %36 = arith.addf %33, %35 : vector<32x32xf32>
    %cst_29 = arith.constant 0.000000e+00 : f32
    %37 = vector.broadcast %cst_29 : f32 to vector<32x32xf32>
    %38 = arith.maximumf %36, %37 : vector<32x32xf32>
    %39 = vector.shape_cast %38 : vector<32x32xf32> to vector<2x16x32xf32>
    %40 = arith.truncf %39 : vector<2x16x32xf32> to vector<2x16x32xbf16>
    %c0_30 = arith.constant 0 : index
    %c8_31 = arith.constant 8 : index
    %c0_32 = arith.constant 0 : index
    %41 = vector.load %arg11[%c0_30, %c8_31, %c0_32] : memref<2x32x32xbf16, #tpu.memory_space<vmem>>, vector<2x16x32xbf16>
    tpu.vector_store %arg11[%c0_30, %c8_31, %c0_32], %40 {strides = array<i32>} : memref<2x32x32xbf16, #tpu.memory_space<vmem>>, vector<2x16x32xbf16>,
    %c0_33 = arith.constant 0 : index
    %c0_34 = arith.constant 0 : index
    %c0_35 = arith.constant 0 : index
    %42 = vector.load %arg11[%c0_33, %c0_34, %c0_35] : memref<2x32x32xbf16, #tpu.memory_space<vmem>>, vector<2x32x32xbf16>
    %43 = vector.extract_strided_slice %42 {offsets = [0, 6, 0], sizes = [2, 16, 32], strides = [1, 1, 1]} : vector<2x32x32xbf16> to vector<2x16x32xbf16>
    %44 = vector.extract_strided_slice %42 {offsets = [0, 7, 0], sizes = [2, 16, 32], strides = [1, 1, 1]} : vector<2x32x32xbf16> to vector<2x16x32xbf16>
    %45 = vector.extract_strided_slice %42 {offsets = [0, 8, 0], sizes = [2, 16, 32], strides = [1, 1, 1]} : vector<2x32x32xbf16> to vector<2x16x32xbf16>
    %46 = vector.extract_strided_slice %42 {offsets = [0, 9, 0], sizes = [2, 16, 32], strides = [1, 1, 1]} : vector<2x32x32xbf16> to vector<2x16x32xbf16>
    %47 = vector.extract_strided_slice %42 {offsets = [0, 10, 0], sizes = [2, 16, 32], strides = [1, 1, 1]} : vector<2x32x32xbf16> to vector<2x16x32xbf16>
    %48 = tpu.concatenate %43, %44, %45, %46, %47 in 2 : vector<2x16x32xbf16>, vector<2x16x32xbf16>, vector<2x16x32xbf16>, vector<2x16x32xbf16>, vector<2x16x32xbf16> -> vector<2x16x160xbf16>
    %49 = vector.shape_cast %48 : vector<2x16x160xbf16> to vector<32x160xbf16>
    %c0_36 = arith.constant 0 : index
    %c0_37 = arith.constant 0 : index
    %50 = vector.load %arg6[%c0_36, %c0_37] : memref<160x32xbf16, #tpu.memory_space<vmem>>, vector<160x32xbf16>
    %cst_38 = arith.constant dense<0.000000e+00> : vector<32x32xf32>
    %51 = tpu.matmul %49, %50, %cst_38 {dimension_numbers = #tpu.dot_dimension_numbers<[1], [0], [0], [1], [0, 0, 1, 1], [], []>} : vector<32x160xbf16>, vector<160x32xbf16>, vector<32x32xf32> -> vector<32x32xf32>
    %c0_39 = arith.constant 0 : index
    %c0_40 = arith.constant 0 : index
    %52 = vector.load %arg7[%c0_39, %c0_40] : memref<1x32xf32, #tpu.memory_space<vmem>>, vector<1x32xf32>
    %53 = vector.broadcast %52 : vector<1x32xf32> to vector<32x32xf32>
    %54 = arith.addf %51, %53 : vector<32x32xf32>
    %cst_41 = arith.constant 0.000000e+00 : f32
    %55 = vector.broadcast %cst_41 : f32 to vector<32x32xf32>
    %56 = arith.maximumf %54, %55 : vector<32x32xf32>
    %57 = vector.shape_cast %56 : vector<32x32xf32> to vector<2x16x32xf32>
    %58 = arith.truncf %57 : vector<2x16x32xf32> to vector<2x16x32xbf16>
    %c0_42 = arith.constant 0 : index
    %c8_43 = arith.constant 8 : index
    %c0_44 = arith.constant 0 : index
    %59 = vector.load %arg11[%c0_42, %c8_43, %c0_44] : memref<2x32x32xbf16, #tpu.memory_space<vmem>>, vector<2x16x32xbf16>
    tpu.vector_store %arg11[%c0_42, %c8_43, %c0_44], %58 {strides = array<i32>} : memref<2x32x32xbf16, #tpu.memory_space<vmem>>, vector<2x16x32xbf16>,
    %c0_45 = arith.constant 0 : index
    %c8_46 = arith.constant 8 : index
    %c0_47 = arith.constant 0 : index
    %60 = vector.load %arg11[%c0_45, %c8_46, %c0_47] : memref<2x32x32xbf16, #tpu.memory_space<vmem>>, vector<2x16x32xbf16>
    %61 = vector.shape_cast %60 : vector<2x16x32xbf16> to vector<32x32xbf16>
    %c0_48 = arith.constant 0 : index
    %c0_49 = arith.constant 0 : index
    %62 = vector.load %arg8[%c0_48, %c0_49] : memref<32x32xbf16, #tpu.memory_space<vmem>>, vector<32x32xbf16>
    %cst_50 = arith.constant dense<0.000000e+00> : vector<32x32xf32>
    %63 = tpu.matmul %61, %62, %cst_50 {dimension_numbers = #tpu.dot_dimension_numbers<[1], [0], [0], [1], [0, 0, 1, 1], [], []>} : vector<32x32xbf16>, vector<32x32xbf16>, vector<32x32xf32> -> vector<32x32xf32>
    %c0_51 = arith.constant 0 : index
    %c0_52 = arith.constant 0 : index
    %64 = vector.load %arg9[%c0_51, %c0_52] : memref<1x32xf32, #tpu.memory_space<vmem>>, vector<1x32xf32>
    %65 = vector.broadcast %64 : vector<1x32xf32> to vector<32x32xf32>
    %66 = arith.addf %63, %65 : vector<32x32xf32>
    %67 = vector.shape_cast %66 : vector<32x32xf32> to vector<2x16x32xf32>
    %c0_53 = arith.constant 0 : index
    %c0_54 = arith.constant 0 : index
    %c0_55 = arith.constant 0 : index
    %68 = vector.load %arg10[%c0_53, %c0_54, %c0_55] : memref<2x16x32xf32, #tpu.memory_space<vmem>>, vector<2x16x32xf32>
    tpu.vector_store %arg10[%c0_53, %c0_54, %c0_55], %67 {strides = array<i32>} : memref<2x16x32xf32, #tpu.memory_space<vmem>>, vector<2x16x32xf32>,
    return
  }
  func.func @transform_0(%arg0: i32) -> (i32, i32, i32) {
    %c0_i32 = arith.constant 0 : i32
    %c0_i32_0 = arith.constant 0 : i32
    %c0_i32_1 = arith.constant 0 : i32
    return %arg0, %c0_i32, %c0_i32_0 : i32, i32, i32
  }
  func.func @transform_1(%arg0: i32) -> (i32, i32) {
    %c0_i32 = arith.constant 0 : i32
    %c0_i32_0 = arith.constant 0 : i32
    %c0_i32_1 = arith.constant 0 : i32
    return %c0_i32, %c0_i32_0 : i32, i32
  }
  func.func @transform_2(%arg0: i32) -> (i32, i32) {
    %c0_i32 = arith.constant 0 : i32
    %c0_i32_0 = arith.constant 0 : i32
    %c0_i32_1 = arith.constant 0 : i32
    return %c0_i32, %c0_i32_0 : i32, i32
  }
  func.func @transform_3(%arg0: i32) -> (i32, i32) {
    %c0_i32 = arith.constant 0 : i32
    %c0_i32_0 = arith.constant 0 : i32
    %c0_i32_1 = arith.constant 0 : i32
    return %c0_i32, %c0_i32_0 : i32, i32
  }
  func.func @transform_4(%arg0: i32) -> (i32, i32) {
    %c0_i32 = arith.constant 0 : i32
    %c0_i32_0 = arith.constant 0 : i32
    %c0_i32_1 = arith.constant 0 : i32
    return %c0_i32, %c0_i32_0 : i32, i32
  }
  func.func @transform_5(%arg0: i32) -> (i32, i32) {
    %c0_i32 = arith.constant 0 : i32
    %c0_i32_0 = arith.constant 0 : i32
    %c0_i32_1 = arith.constant 0 : i32
    return %c0_i32, %c0_i32_0 : i32, i32
  }
  func.func @transform_6(%arg0: i32) -> (i32, i32) {
    %c0_i32 = arith.constant 0 : i32
    %c0_i32_0 = arith.constant 0 : i32
    %c0_i32_1 = arith.constant 0 : i32
    return %c0_i32, %c0_i32_0 : i32, i32
  }
  func.func @transform_7(%arg0: i32) -> (i32, i32) {
    %c0_i32 = arith.constant 0 : i32
    %c0_i32_0 = arith.constant 0 : i32
    %c0_i32_1 = arith.constant 0 : i32
    return %c0_i32, %c0_i32_0 : i32, i32
  }
  func.func @transform_8(%arg0: i32) -> (i32, i32) {
    %c0_i32 = arith.constant 0 : i32
    %c0_i32_0 = arith.constant 0 : i32
    %c0_i32_1 = arith.constant 0 : i32
    return %c0_i32, %c0_i32_0 : i32, i32
  }
  func.func @transform_9(%arg0: i32) -> (i32, i32, i32) {
    %c0_i32 = arith.constant 0 : i32
    %c0_i32_0 = arith.constant 0 : i32
    %c0_i32_1 = arith.constant 0 : i32
    return %arg0, %c0_i32, %c0_i32_0 : i32, i32, i32
  }
}

</mosaic_0001>

<bundles_post_ra>
// kernel: tpu_custom_call.1
= control target key start
LH: loop header
LB: loop body
LE: loop exit
PB: predicated region body
PF: predicated region fallthrough
CT: control target
= control target key end

     0   :  { %14 = vsyncpa [#allocation4], 0  ;;  %s1957_s0 = inlined_call_operand.hbm [shape: bf16[2,16,32], index: 0, kind: input, shape index: {}]   ;;  %s1958_s1 = inlined_call_operand.hbm [shape: bf16[160,32], index: 1, kind: input, shape index: {}]   ;;  %s1959_s2 = inlined_call_operand.hbm [shape: f32[1,32], index: 2, kind: input, shape index: {}]   ;;  %s1960_s3 = inlined_call_operand.hbm [shape: bf16[160,32], index: 3, kind: input, shape index: {}]   ;;  %s1961_s4 = inlined_call_operand.hbm [shape: f32[1,32], index: 4, kind: input, shape index: {}]   ;;  %s1962_s5 = inlined_call_operand.hbm [shape: bf16[160,32], index: 5, kind: input, shape index: {}]   ;;  %s1963_s6 = inlined_call_operand.hbm [shape: f32[1,32], index: 6, kind: input, shape index: {}]   ;;  %s1964_s7 = inlined_call_operand.hbm [shape: bf16[32,32], index: 7, kind: input, shape index: {}]   ;;  %s1965_s8 = inlined_call_operand.hbm [shape: f32[1,32], index: 8, kind: input, shape index: {}]   ;;  %s1966_s9 = inlined_call_operand.hbm [shape: f32[2,16,32], index: 9, kind: output, shape index: {}]  }
   0x1   :  { %15 = vsyncpa [#allocation7], 0 }
   0x2   :  { %16 = vsyncpa [#allocation10], 0 }
   0x3   :  { %17 = vsyncpa [#allocation13], 0 }
   0x4   :  { %18 = vsyncpa [#allocation16], 0 }
   0x5   :  { %19 = vsyncpa [#allocation5], 0  ;;  %s1515_s30 = smov [#allocation6]   ;;  %s1516_s11 = smov [#allocation9]  }
   0x6   :  { %s37_s10 = sshll.u32 %s1515_s30, 4  ;;  %s59_s12 = sshll.u32 %s1516_s11, 4  ;;  %s38_s10 = int_to_ptr.vmem [resolvable:$true] %s37_s10  ;;  %s1582_s12 = int_to_ptr.vmem [resolvable:$true] %s59_s12 }
   0x7   :  { %s1283_s15 = scalar_lea.hbm %s1958_s1, 1280 }
   0x8   :  { %p1284_p0 = scmp.ne.s32.totalorder %s1958_s1, %s1283_s15  ;;  %p1287_p1 = scmp.lt.u32.totalorder %s1283_s15, %s1958_s1 }
   0xa   :  { %p1289_p2 = pnand %p1287_p1, %p1284_p0 }
   0xc   :  { %1292 = shalt.err (!%p1289_p2)
}
   0xd   :  { %s1293_s20 = scalar_lea.vmem %s38_s10, 1280  ;;  %p1298_p4 = scmp.lt.s32.totalorder %s38_s10, %s38_s10 }
   0xe   :  { %p1294_p3 = scmp.ne.s32.totalorder %s38_s10, %s1293_s20  ;;  %p1299_p5 = scmp.lt.s32.totalorder %s1293_s20, %s1293_s20 }
  0x10   :  { %p1300_p6 = por %p1299_p5, %p1298_p4 }
  0x12   :  { %p1301_p7 = pnand %p1300_p6, %p1294_p3 }
  0x14   :  { %1304 = shalt.err (!%p1301_p7)
}
  0x15   :  { %s1517_s21 = smov 64   ;;  %s1518_s22 = smov 4  }
  0x16   :  { %43 = dma.hbm_to_vmem [thread:$0]  %s1958_s1, 1280, %s38_s10, [#allocation7], %s1517_s21, %s1517_s21, %s1518_s22  }
  0x17   :  { %s1305_s27 = scalar_lea.hbm %s1960_s3, 1280 }
  0x18   :  { %p1306_p8 = scmp.ne.s32.totalorder %s1960_s3, %s1305_s27  ;;  %p1309_p9 = scmp.lt.u32.totalorder %s1305_s27, %s1960_s3 }
  0x1a   :  { %p1311_p10 = pnand %p1309_p9, %p1306_p8 }
  0x1c   :  { %1314 = shalt.err (!%p1311_p10)
}
  0x1d   :  { %s1315_s13 = scalar_lea.vmem %s1582_s12, 1280  ;;  %p1320_p12 = scmp.lt.s32.totalorder %s1582_s12, %s1582_s12 }
  0x1e   :  { %p1316_p11 = scmp.ne.s32.totalorder %s1582_s12, %s1315_s13  ;;  %p1321_p13 = scmp.lt.s32.totalorder %s1315_s13, %s1315_s13 }
  0x20   :  { %p1322_p0 = por %p1321_p13, %p1320_p12 }
  0x22   :  { %p1323_p1 = pnand %p1322_p0, %p1316_p11 }
  0x24   :  { %1326 = shalt.err (!%p1323_p1)
}
  0x25   :  { %65 = dma.hbm_to_vmem [thread:$0]  %s1960_s3, 1280, %s1582_s12, [#allocation10], %s1517_s21, %s1517_s21, %s1518_s22  }
  0x26   :  { %s1519_s14 = smov [#allocation12]   ;;  %s1520_s16 = smov [#allocation15]  }
  0x27   :  { %s81_s15 = sshll.u32 %s1519_s14, 4  ;;  %s103_s17 = sshll.u32 %s1520_s16, 4  ;;  %s82_s15 = int_to_ptr.vmem [resolvable:$true] %s81_s15  ;;  %s1619_s17 = int_to_ptr.vmem [resolvable:$true] %s103_s17 }
  0x28   :  { %s1327_s20 = scalar_lea.hbm %s1962_s5, 1280 }
  0x29   :  { %p1328_p2 = scmp.ne.s32.totalorder %s1962_s5, %s1327_s20  ;;  %p1331_p3 = scmp.lt.u32.totalorder %s1327_s20, %s1962_s5 }
  0x2b   :  { %p1333_p4 = pnand %p1331_p3, %p1328_p2 }
  0x2d   :  { %1336 = shalt.err (!%p1333_p4)
}
  0x2e   :  { %s1337_s3 = scalar_lea.vmem %s82_s15, 1280  ;;  %p1342_p6 = scmp.lt.s32.totalorder %s82_s15, %s82_s15 }
  0x2f   :  { %p1338_p5 = scmp.ne.s32.totalorder %s82_s15, %s1337_s3  ;;  %p1343_p7 = scmp.lt.s32.totalorder %s1337_s3, %s1337_s3 }
  0x31   :  { %p1344_p8 = por %p1343_p7, %p1342_p6 }
  0x33   :  { %p1345_p9 = pnand %p1344_p8, %p1338_p5 }
  0x35   :  { %1348 = shalt.err (!%p1345_p9)
}
  0x36   :  { %87 = dma.hbm_to_vmem [thread:$0]  %s1962_s5, 1280, %s82_s15, [#allocation13], %s1517_s21, %s1517_s21, %s1518_s22  }
  0x37   :  { %s1349_s30 = scalar_lea.hbm %s1964_s7, 256 }
  0x38   :  { %p1350_p10 = scmp.ne.s32.totalorder %s1964_s7, %s1349_s30  ;;  %p1353_p11 = scmp.lt.u32.totalorder %s1349_s30, %s1964_s7 }
  0x3a   :  { %p1355_p12 = pnand %p1353_p11, %p1350_p10 }
  0x3c   :  { %1358 = shalt.err (!%p1355_p12)
}
  0x3d   :  { %s1359_s14 = scalar_lea.vmem %s1619_s17, 256  ;;  %p1364_p0 = scmp.lt.s32.totalorder %s1619_s17, %s1619_s17 }
  0x3e   :  { %p1360_p13 = scmp.ne.s32.totalorder %s1619_s17, %s1359_s14  ;;  %p1365_p1 = scmp.lt.s32.totalorder %s1359_s14, %s1359_s14 }
  0x40   :  { %p1366_p2 = por %p1365_p1, %p1364_p0 }
  0x42   :  { %p1367_p3 = pnand %p1366_p2, %p1360_p13 }
  0x44   :  { %1370 = shalt.err (!%p1367_p3)
}
  0x45   :  { %109 = dma.hbm_to_vmem [thread:$0]  %s1964_s7, 256, %s1619_s17, [#allocation16], %s1517_s21, %s1517_s21, %s1518_s22  }
  0x46   :  { %s1521_s16 = smov [#allocation3]   ;;  %s1522_s19 = smov [#allocation8]  }
  0x47   :  { %s25_s18 = sshll.u32 %s1521_s16, 4  ;;  %s50_s20 = sshll.u32 %s1522_s19, 4  ;;  %s26_s18 = int_to_ptr.vmem [resolvable:$true] %s25_s18  ;;  %s51_s20 = int_to_ptr.vmem [resolvable:$true] %s50_s20 }
  0x48   :  { %s1371_s25 = scalar_lea.hbm %s1957_s0, 256 }
  0x49   :  { %p1372_p4 = scmp.ne.s32.totalorder %s1957_s0, %s1371_s25  ;;  %p1375_p5 = scmp.lt.u32.totalorder %s1371_s25, %s1957_s0 }
  0x4b   :  { %p1377_p6 = pnand %p1375_p5, %p1372_p4 }
  0x4d   :  { %1380 = shalt.err (!%p1377_p6)
}
  0x4e   :  { %s1381_s7 = scalar_lea.vmem %s26_s18, 256  ;;  %p1386_p8 = scmp.lt.s32.totalorder %s26_s18, %s26_s18 }
  0x4f   :  { %p1382_p7 = scmp.ne.s32.totalorder %s26_s18, %s1381_s7  ;;  %p1387_p9 = scmp.lt.s32.totalorder %s1381_s7, %s1381_s7 }
  0x51   :  { %p1388_p10 = por %p1387_p9, %p1386_p8 }
  0x53   :  { %p1389_p11 = pnand %p1388_p10, %p1382_p7 }
  0x55   :  { %1392 = shalt.err (!%p1389_p11)
}
  0x56   :  { %31 = dma.hbm_to_vmem [thread:$0]  %s1957_s0, 256, %s26_s18, [#allocation4], %s1517_s21, %s1517_s21, %s1518_s22  }
  0x57   :  { %s1393_s11 = scalar_lea.hbm %s1959_s2, 16 }
  0x58   :  { %p1394_p12 = scmp.ne.s32.totalorder %s1959_s2, %s1393_s11  ;;  %p1397_p13 = scmp.lt.u32.totalorder %s1393_s11, %s1959_s2 }
  0x5a   :  { %p1399_p0 = pnand %p1397_p13, %p1394_p12 }
  0x5c   :  { %1402 = shalt.err (!%p1399_p0)
}
  0x5d   :  { %s1403_s5 = scalar_lea.vmem %s51_s20, 16  ;;  %s1407_s15 = scalar_lea.vmem %s51_s20, 32 }
  0x5e   :  { %p1404_p1 = scmp.ne.s32.totalorder %s51_s20, %s1403_s5  ;;  %p1408_p2 = scmp.lt.s32.totalorder %s51_s20, %s51_s20 }
  0x5f   :  { %p1409_p3 = scmp.lt.s32.totalorder %s1407_s15, %s1403_s5 }
  0x61   :  { %p1410_p4 = por %p1409_p3, %p1408_p2 }
  0x63   :  { %p1411_p5 = pnand %p1410_p4, %p1404_p1 }
  0x65   :  { %1414 = shalt.err (!%p1411_p5)
}
  0x66   :  { %53 = dma.hbm_to_vmem [thread:$0]  %s1959_s2, 16, %s51_s20, [#allocation7]  }
  0x67   :  { %s1523_s16 = smov [#allocation11]   ;;  %s1524_s19 = smov [#allocation14]  }
  0x68   :  { %s72_s18 = sshll.u32 %s1523_s16, 4  ;;  %s94_s23 = sshll.u32 %s1524_s19, 4  ;;  %s73_s18 = int_to_ptr.vmem [resolvable:$true] %s72_s18  ;;  %s95_s23 = int_to_ptr.vmem [resolvable:$true] %s94_s23 }
  0x69   :  { %s1415_s26 = scalar_lea.hbm %s1961_s4, 16 }
  0x6a   :  { %p1416_p6 = scmp.ne.s32.totalorder %s1961_s4, %s1415_s26  ;;  %p1419_p7 = scmp.lt.u32.totalorder %s1415_s26, %s1961_s4 }
  0x6c   :  { %p1421_p8 = pnand %p1419_p7, %p1416_p6 }
  0x6e   :  { %1424 = shalt.err (!%p1421_p8)
}
  0x6f   :  { %s1425_s2 = scalar_lea.vmem %s73_s18, 16  ;;  %s1429_s20 = scalar_lea.vmem %s73_s18, 32 }
  0x70   :  { %p1426_p9 = scmp.ne.s32.totalorder %s73_s18, %s1425_s2  ;;  %p1430_p10 = scmp.lt.s32.totalorder %s73_s18, %s73_s18 }
  0x71   :  { %p1431_p11 = scmp.lt.s32.totalorder %s1429_s20, %s1425_s2 }
  0x73   :  { %p1432_p12 = por %p1431_p11, %p1430_p10 }
  0x75   :  { %p1433_p13 = pnand %p1432_p12, %p1426_p9 }
  0x77   :  { %1436 = shalt.err (!%p1433_p13)
}
  0x78   :  { %75 = dma.hbm_to_vmem [thread:$0]  %s1961_s4, 16, %s73_s18, [#allocation10]  }
  0x79   :  { %s1437_s11 = scalar_lea.hbm %s1963_s6, 16 }
  0x7a   :  { %p1438_p0 = scmp.ne.s32.totalorder %s1963_s6, %s1437_s11  ;;  %p1441_p1 = scmp.lt.u32.totalorder %s1437_s11, %s1963_s6 }
  0x7c   :  { %p1443_p2 = pnand %p1441_p1, %p1438_p0 }
  0x7e   :  { %1446 = shalt.err (!%p1443_p2)
}
  0x7f   :  { %s1447_s5 = scalar_lea.vmem %s95_s23, 16  ;;  %s1451_s15 = scalar_lea.vmem %s95_s23, 32 }
  0x80   :  { %p1448_p3 = scmp.ne.s32.totalorder %s95_s23, %s1447_s5  ;;  %p1452_p4 = scmp.lt.s32.totalorder %s95_s23, %s95_s23 }
  0x81   :  { %p1453_p5 = scmp.lt.s32.totalorder %s1451_s15, %s1447_s5 }
  0x83   :  { %p1454_p6 = por %p1453_p5, %p1452_p4 }
  0x85   :  { %p1455_p7 = pnand %p1454_p6, %p1448_p3 }
  0x87   :  { %1458 = shalt.err (!%p1455_p7)
}
  0x88   :  { %97 = dma.hbm_to_vmem [thread:$0]  %s1963_s6, 16, %s95_s23, [#allocation13]  }
  0x89   :  { %s1525_s22 = smov [#allocation17]   ;;  %s1459_s24 = scalar_lea.hbm %s1965_s8, 16 }
  0x8a   :  { %s116_s16 = sshll.u32 %s1525_s22, 4  ;;  %p1460_p8 = scmp.ne.s32.totalorder %s1965_s8, %s1459_s24  ;;  %s117_s16 = int_to_ptr.vmem [resolvable:$true] %s116_s16 }
  0x8b   :  { %p1463_p9 = scmp.lt.u32.totalorder %s1459_s24, %s1965_s8 }
  0x8d   :  { %p1465_p10 = pnand %p1463_p9, %p1460_p8 }
  0x8f   :  { %1468 = shalt.err (!%p1465_p10)
}
  0x90   :  { %s1469_s27 = scalar_lea.vmem %s117_s16, 16  ;;  %s1473_s6 = scalar_lea.vmem %s117_s16, 32 }
  0x91   :  { %p1470_p11 = scmp.ne.s32.totalorder %s117_s16, %s1469_s27  ;;  %p1474_p12 = scmp.lt.s32.totalorder %s117_s16, %s117_s16 }
  0x92   :  { %p1475_p13 = scmp.lt.s32.totalorder %s1473_s6, %s1469_s27 }
  0x94   :  { %p1476_p0 = por %p1475_p13, %p1474_p12 }
  0x96   :  { %p1477_p1 = pnand %p1476_p0, %p1470_p11 }
  0x98   :  { %1480 = shalt.err (!%p1477_p1)
}
  0x99   :  { %119 = dma.hbm_to_vmem [thread:$0]  %s1965_s8, 16, %s117_s16, [#allocation16]  }
  0x9a   :  { %1503 = dma.done.wait [#allocation4], 256  }
  0x9b   :  { %1504 = vsyncadd [#allocation4], 4294967040 }
  0x9c   :  { %1505 = dma.done.wait [#allocation7], 1296  }
  0x9d   :  { %1506 = vsyncadd [#allocation7], 4294966000 }
  0x9e   :  { %1507 = dma.done.wait [#allocation10], 1296  }
  0x9f   :  { %1508 = vsyncadd [#allocation10], 4294966000 }
  0xa0   :  { %1509 = dma.done.wait [#allocation13], 1296  }
  0xa1   :  { %1510 = vsyncadd [#allocation13], 4294966000 }
  0xa2   :  { %1511 = dma.done.wait [#allocation16], 272  }
  0xa3   :  { %1512 = vsyncadd [#allocation16], 4294967024  ;;  %vm151_vm0 = vcmask 258052   ;;  %vm148_vm1 = vcmask 257027   ;;  %v1526_v0 = vmov 0   ;;  %vm176_vm2 = vcmask 257024  }
  0xa4   :  { %152 = vst.msk [vmem:[#allocation2 + $0x8] sm:$0x10] %vm151_vm0, %v1526_v0  ;;  %153 = vst.msk [vmem:[#allocation2 + $0x18] sm:$0x10] %vm151_vm0, %v1526_v0  ;;  %411 = vmatprep.subr.bf16.mxu0 %v1526_v0  ;;  %699 = vmatprep.subr.bf16.mxu1 %v1526_v0  ;;  %vm174_vm3 = vcmask 261124   ;;  %v1251_v5 = vld [vmem:[#allocation6] sm:$0xff]  }
  0xa5   :  { %150 = vst.msk [vmem:[#allocation2 + $0x10] sm:$0x8] %vm148_vm1, %v1526_v0  ;;  %149 = vst.msk [vmem:[#allocation2] sm:$0x8] %vm148_vm1, %v1526_v0  ;;  %v1247_v1 = vld [vmem:[#allocation3 + $0x4] ss:$0 sps:$4 sm:$0xff]   ;;  %412 = vmatpush1.bf16.msra.mxu0 %v1251_v5 }
  0xa6   :  { %v1248_v2 = vld [vmem:[#allocation3 + $0x8] ss:$0 sps:$4 sm:$0xff]   ;;  %v1249_v3 = vld [vmem:[#allocation3 + $0xc] ss:$0 sps:$4 sm:$0xff]   ;;  %177 = vst.msk [vmem:[#allocation2 + $0x8] sm:$0xf] %vm176_vm2, %v1247_v1  ;;  %413 = vmatprep.subr.bf16.mxu0 %v1526_v0 }
  0xa7   :  { %v1250_v4 = vld [vmem:[#allocation3] ss:$0 sps:$4 sm:$0xff]   ;;  %178 = vst.msk [vmem:[#allocation2 + $0x10] sm:$0xf0] %vm174_vm3, %v1248_v2  ;;  %v1252_v6 = vld [vmem:[#allocation6 + $0x8] sm:$0xff]   ;;  %vm227_vm4 = vcmask 1046528  }
  0xa8   :  { %179 = vst.msk [vmem:[#allocation2 + $0x18] sm:$0xf] %vm176_vm2, %v1249_v3  ;;  %v1253_v8 = vld [vmem:[#allocation6 + $0x10] sm:$0xff]   ;;  %vm184_vm5 = vsmask.f32 7424  ;;  %v1254_v23 = vld [vmem:[#allocation6 + $0x18] sm:$0xff]  }
  0xa9   :  { %175 = vst.msk [vmem:[#allocation2] sm:$0xf0] %vm174_vm3, %v1250_v4  ;;  %414 = vmatpush1.bf16.msra.mxu0 %v1252_v6  ;;  %vm242_vm6 = vsmask.f32 6400  ;;  %v1255_v34 = vld [vmem:[#allocation6 + $0x20] sm:$0xff]   ;;  %vm272_vm7 = vcmask 261120  }
  0xaa   :  { %415 = vmatprep.subr.bf16.mxu0 %v1526_v0  ;;  %s1527_s8 = smov 32   ;;  %vm265_vm8 = vcmask 1045504   ;;  %v1256_v41 = vld [vmem:[#allocation6 + $0x28] sm:$0xff]   ;;  %vm303_vm9 = vcmask 1044480   ;;  %s1528_s2 = smov 96   ;;  %v1257_v55 = vld [vmem:[#allocation6 + $0x30] sm:$0xff]  }
  0xab   :  { %v1258_v59 = vld [vmem:[#allocation6 + $0x38] sm:$0xff]   ;;  %v1259_v61 = vld [vmem:[#allocation6 + $0x40] sm:$0xff]   ;;  %v1260_v62 = vld [vmem:[#allocation6 + $0x48] sm:$0xff]   ;;  %vm281_vm10 = vcmask 523264   ;;  %vm290_vm11 = vcmask 785408   ;;  %vm1060_vm12 = vcmask 1043456  }
  0xad   :  { %v1730_v7 = vld [vmem:[#allocation2 + $0x8] sm:$0xff]  ;;  %416 = vmatpush1.bf16.msra.mxu0 %v1253_v8 }
  0xae   :  { %v229_v9 = vrot.slane %v1730_v7, 1  ;;  %v1733_v10 = vld [vmem:[#allocation2 + $0x10] sm:$0xff]  ;;  %v193_v12 = vshll.u32 %v1730_v7, 16  ;;  %v197_v13 = vshrl.u32 %v1730_v7, 16  ;;  %417 = vmatprep.subr.bf16.mxu0 %v1526_v0  ;;  %v267_v42 = vrot.slane %v1730_v7, 2 }
  0xaf   :  { %v1735_v11 = vld [vmem:[#allocation2 + $0x18] sm:$0xff]  ;;  %v231_v14 = vrot.slane %v1733_v10, 1  ;;  %v203_v31 = vshll.u32 %v1733_v10, 16  ;;  %v201_v37 = vshrl.u32 %v1733_v10, 16  ;;  %v269_v4 = vrot.slane %v1733_v10, 2 }
  0xb0   :  { %v232_v15 = vrot.slane %v1735_v11, 1  ;;  %v1742_v16 = vld [vmem:[#allocation2] sm:$0xff]  ;;  %236 = vrot.lane.b32.xlu1 %v229_v9, %s1517_s21  ;;  %v195_v17 = vrot.slane %v193_v12, 1  ;;  %v246_v22 = vrot.slane %v197_v13, 1  ;;  %v247_v26 = vrot.slane %v193_v12, 2 }
  0xb1   :  { %v186_v18 = vshrl.u32 %v1742_v16, 16  ;;  %v188_v19 = vshll.u32 %v1742_v16, 16  ;;  %v228_v21 = vrot.slane %v1742_v16, 1  ;;  %v208_v30 = vshll.u32 %v1735_v11, 16  ;;  %418 = vmatpush1.bf16.msra.mxu0 %v1254_v23 }
  0xb2   :  { %v233_v20 = vsel %vm227_vm4, %v231_v14, %v232_v15  ;;  %v199_v24 = vor.u32 %v197_v13, %v195_v17  ;;  %v212_v33 = vshrl.u32 %v1735_v11, 16  ;;  %v266_v35 = vrot.slane %v1742_v16, 2  ;;  %419 = vmatprep.subr.bf16.mxu0 %v1526_v0 }
  0xb3   :  { %238 = vrot.lane.b32.xlu0 %v233_v20, %s1517_s21  ;;  %v190_v25 = vrot.slane %v188_v19, 1  ;;  %v243_v27 = vrot.slane %v186_v18, 1  ;;  %v244_v28 = vrot.slane %v188_v19, 2  ;;  %v230_v32 = vsel %vm227_vm4, %v228_v21, %v229_v9 }
  0xb4   :  { %240 = vrot.lane.b32.xlu1 %v232_v15, %s1517_s21  ;;  %v248_v36 = vor.u32 %v247_v26, %v246_v22  ;;  %v205_v40 = vrot.slane %v203_v31, 1  ;;  %v210_v43 = vrot.slane %v208_v30, 1  ;;  %v253_v44 = vrot.slane %v212_v33, 1 }
  0xb5   :  { %v191_v29 = vor.u32 %v190_v25, %v186_v18  ;;  %v245_v39 = vor.u32 %v244_v28, %v243_v27  ;;  %420 = vmatpush1.bf16.msra.mxu0 %v1255_v34  ;;  %v268_v45 = vsel %vm265_vm8, %v266_v35, %v267_v42  ;;  %v308_v46 = vrot.slane %v267_v42, 3  ;;  %v1267_v42 = vld [vmem:[#allocation9 + $0x30] sm:$0xff]  }
  0xb6   :  { %v254_v47 = vrot.slane %v208_v30, 2  ;;  %421 = vmatprep.subr.bf16.mxu0 %v1526_v0  ;;  %v307_v48 = vrot.slane %v268_v45, 3  ;;  %v206_v50 = vor.u32 %v205_v40, %v201_v37  ;;  %v250_v51 = vrot.slane %v201_v37, 1  ;;  %v1261_v37 = vld [vmem:[#allocation9] sm:$0xff]  }
  0xb7   :  { %217 = vrot.lane.b32.xlu0 %v199_v24, %s1527_s8  ;;  %v196_v38 = vsel %vm184_vm5, %v191_v29, %v195_v17  ;;  %v249_v49 = vsel %vm242_vm6, %v245_v39, %v248_v36  ;;  %v251_v52 = vrot.slane %v203_v31, 2  ;;  %v214_v53 = vor.u32 %v212_v33, %v210_v43  ;;  %700 = vmatpush1.bf16.msra.mxu1 %v1261_v37  ;;  %v1264_v39 = vld [vmem:[#allocation9 + $0x18] sm:$0xff]   ;;  %v1265_v40 = vld [vmem:[#allocation9 + $0x20] sm:$0xff]  }
  0xb8   :  { %234 = vrot.lane.b32.xlu1 %v230_v32, %s1517_s21  ;;  %v309_v54 = vsel %vm303_vm9, %v307_v48, %v308_v46  ;;  %v211_v56 = vsel %vm184_vm5, %v206_v50, %v210_v43  ;;  %v255_v57 = vor.u32 %v254_v47, %v253_v44  ;;  %v270_v5 = vrot.slane %v1735_v11, 2  ;;  %701 = vmatprep.subr.bf16.mxu1 %v1526_v0  ;;  %v1174_v43 = vld [vmem:[#allocation8] ss:$0 sm:$0xff] }
  0xb9   :  { %422 = vmatpush1.bf16.msra.mxu0 %v1256_v41  ;;  %1185 = vmatprep.mubr.msk.bf16.mxu0 %vm272_vm7, %v309_v54  ;;  %v252_v58 = vor.u32 %v251_v52, %v250_v51  ;;  %v1266_v41 = vld [vmem:[#allocation9 + $0x28] sm:$0xff]   ;;  %v1268_v54 = vld [vmem:[#allocation9 + $0x38] sm:$0xff]  }
  0xba   :  { %423 = vmatprep.subr.bf16.mxu0 %v1526_v0  ;;  %v271_v12 = vsel %vm265_vm8, %v269_v4, %v270_v5  ;;  %v314_v19 = vrot.slane %v270_v5, 3  ;;  %v1270_v5 = vld [vmem:[#allocation9 + $0x48] sm:$0xff]  }
  0xbb   :  { %215 = vrot.lane.b32.xlu0 %v196_v38, %s1527_s8  ;;  %v256_v60 = vsel %vm242_vm6, %v252_v58, %v255_v57  ;;  %v313_v18 = vrot.slane %v271_v12, 3  ;;  %v1263_v38 = vld [vmem:[#allocation9 + $0x10] sm:$0xff]  }
  0xbc   :  { %259 = vrot.lane.b32.xlu1 %v248_v36, %s1528_s2 }
  0xbd   :  { %424 = vmatpush1.bf16.msra.mxu0 %v1257_v55 }
  0xbe   :  { %425 = vmatprep.subr.bf16.mxu0 %v1526_v0 }
  0xbf   :  { %257 = vrot.lane.b32.xlu0 %v249_v49, %s1528_s2 }
  0xc0   :  { %221 = vrot.lane.b32.xlu1 %v214_v53, %s1527_s8 }
  0xc1   :  { %426 = vmatpush1.bf16.msra.mxu0 %v1258_v59 }
  0xc2   :  { %427 = vmatprep.subr.bf16.mxu0 %v1526_v0 }
  0xc3   :  { %219 = vrot.lane.b32.xlu0 %v211_v56, %s1527_s8 }
  0xc4   :  { %263 = vrot.lane.b32.xlu1 %v255_v57, %s1528_s2 }
  0xc5   :  { %428 = vmatpush1.bf16.msra.mxu0 %v1259_v61 }
  0xc6   :  { %429 = vmatprep.subr.bf16.mxu0 %v1526_v0 }
  0xc7   :  { %261 = vrot.lane.b32.xlu0 %v256_v60, %s1528_s2 }
  0xc9   :  { %430 = vmatpush1.bf16.msra.mxu0 %v1260_v62 }
  0xca   :  { %987 = vmatprep.subr.bf16.mxu0 %v1526_v0 }
 0x122   :  { %v237_v63 = vpop.permute.xlu1 %236 }
 0x125   :  { %v239_v1 = vpop.permute.xlu0 %238 }
 0x126   :  { %v241_v2 = vpop.permute.xlu1 %240 }
 0x129   :  { %v218_v3 = vpop.permute.xlu0 %217 }
 0x12a   :  { %v235_v6 = vpop.permute.xlu1 %234  ;;  %v276_v8 = vsel %vm272_vm7, %v1730_v7, %v218_v3 }
 0x12b   :  { %v285_v14 = vsel %vm281_vm10, %v276_v8, %v237_v63  ;;  %v1269_v63 = vld [vmem:[#allocation9 + $0x40] sm:$0xff]  }
 0x12d   :  { %v216_v9 = vpop.permute.xlu0 %215 }
 0x12e   :  { %v274_v13 = vsel %vm272_vm7, %v1742_v16, %v216_v9  ;;  %v260_v15 = vpop.permute.xlu1 %259  ;;  %v315_v16 = vsel %vm303_vm9, %v313_v18, %v314_v19 }
 0x12f   :  { %v294_v17 = vsel %vm290_vm11, %v285_v14, %v260_v15  ;;  %v283_v21 = vsel %vm281_vm10, %v274_v13, %v235_v6 }
 0x130   :  { %v305_v20 = vrot.slane %v294_v17, 3 }
 0x131   :  { %v258_v22 = vpop.permute.xlu0 %257 }
 0x132   :  { %v292_v7 = vsel %vm290_vm11, %v283_v21, %v258_v22  ;;  %v222_v24 = vpop.permute.xlu1 %221 }
 0x133   :  { %v304_v23 = vrot.slane %v292_v7, 3  ;;  %v280_v25 = vsel %vm272_vm7, %v1735_v11, %v222_v24 }
 0x134   :  { %v289_v29 = vsel %vm281_vm10, %v280_v25, %v241_v2 }
 0x135   :  { %v220_v26 = vpop.permute.xlu0 %219  ;;  %v306_v27 = vsel %vm303_vm9, %v304_v23, %v305_v20 }
 0x136   :  { %v278_v28 = vsel %vm272_vm7, %v1733_v10, %v220_v26  ;;  %444 = vmatmul.mubr.bf16.vlgmr.msra.gmra.mrb[0].mxu0 %v306_v27  ;;  %v264_v30 = vpop.permute.xlu1 %263  ;;  %v1262_v10 = vld [vmem:[#allocation9 + $0x8] sm:$0xff]  }
 0x137   :  { %1186 = vmatprep.mubr.msk.bf16.mxu0 %vm272_vm7, %v315_v16  ;;  %v298_v31 = vsel %vm290_vm11, %v289_v29, %v264_v30  ;;  %v287_v33 = vsel %vm281_vm10, %v278_v28, %v239_v1  ;;  %702 = vmatpush1.bf16.msra.mxu1 %v1262_v10 }
 0x138   :  { %v311_v32 = vrot.slane %v298_v31, 3  ;;  %703 = vmatprep.subr.bf16.mxu1 %v1526_v0 }
 0x139   :  { %v262_v11 = vpop.permute.xlu0 %261 }
 0x13a   :  { %v296_v34 = vsel %vm290_vm11, %v287_v33, %v262_v11 }
 0x13b   :  { %v310_v35 = vrot.slane %v296_v34, 3  ;;  %704 = vmatpush1.bf16.msra.mxu1 %v1263_v38 }
 0x13c   :  { %705 = vmatprep.subr.bf16.mxu1 %v1526_v0 }
 0x13d   :  { %v312_v36 = vsel %vm303_vm9, %v310_v35, %v311_v32 }
 0x13e   :  { %452 = vmatmul.mubr.bf16.gmra.mrb[4].mxu0 %v312_v36 }
 0x13f   :  { %706 = vmatpush1.bf16.msra.mxu1 %v1264_v39 }
 0x140   :  { %707 = vmatprep.subr.bf16.mxu1 %v1526_v0 }
 0x143   :  { %708 = vmatpush1.bf16.msra.mxu1 %v1265_v40 }
 0x144   :  { %709 = vmatprep.subr.bf16.mxu1 %v1526_v0 }
 0x147   :  { %710 = vmatpush1.bf16.msra.mxu1 %v1266_v41 }
 0x148   :  { %711 = vmatprep.subr.bf16.mxu1 %v1526_v0 }
 0x14b   :  { %712 = vmatpush1.bf16.msra.mxu1 %v1267_v42 }
 0x14c   :  { %713 = vmatprep.subr.bf16.mxu1 %v1526_v0 }
 0x14f   :  { %714 = vmatpush1.bf16.msra.mxu1 %v1268_v54 }
 0x150   :  { %715 = vmatprep.subr.bf16.mxu1 %v1526_v0 }
 0x153   :  { %716 = vmatpush1.bf16.msra.mxu1 %v1269_v63 }
 0x154   :  { %717 = vmatprep.subr.bf16.mxu1 %v1526_v0 }
 0x157   :  { %718 = vmatpush1.bf16.msra.mxu1 %v1270_v5 }
 0x209   :  { %v445_v44 = vpop.f32.mrb[0].mxu0 }
 0x20a   :  { %v446_v45 = vadd.f32 %v1174_v43, %v445_v44  ;;  %v447_v46 = vpop.f32.mrb[1].mxu0 }
 0x20b   :  { %v448_v47 = vpop.f32.mrb[2].mxu0 }
 0x20c   :  { %v449_v48 = vadd.f32 %v1174_v43, %v448_v47  ;;  %v450_v49 = vpop.f32.mrb[3].mxu0  ;;  %v460_v50 = vmax.f32 %v446_v45, 0.0 }
 0x20e   :  { %v461_v51 = vmax.f32 %v449_v48, 0.0 }
 0x210   :  { %v464_v52 = vpack.c.bf16 %v461_v51, %v460_v50 }
 0x211   :  { %v453_v53 = vpop.f32.mrb[4].mxu0 }
 0x212   :  { %v468_v55 = vrot.slane %v464_v52, 4  ;;  %v454_v56 = vadd.f32 %v1174_v43, %v453_v53  ;;  %v455_v57 = vpop.f32.mrb[5].mxu0 }
 0x213   :  { %v456_v58 = vpop.f32.mrb[6].mxu0 }
 0x214   :  { %472 = vst.msk [vmem:[#allocation2] sm:$0xf0] %vm174_vm3, %v468_v55  ;;  %v457_v59 = vadd.f32 %v1174_v43, %v456_v58  ;;  %v458_v60 = vpop.f32.mrb[7].mxu0  ;;  %v462_v61 = vmax.f32 %v454_v56, 0.0 }
 0x215   :  { %473 = vst.msk [vmem:[#allocation2 + $0x8] sm:$0xf] %vm176_vm2, %v468_v55 }
 0x216   :  { %v463_v62 = vmax.f32 %v457_v59, 0.0 }
 0x218   :  { %v465_v1 = vpack.c.bf16 %v463_v62, %v462_v61 }
 0x21a   :  { %v469_v2 = vrot.slane %v465_v1, 4 }
 0x21b   :  { %v1818_v4 = vld [vmem:[#allocation2] sm:$0xff] }
 0x21c   :  { %v1816_v3 = vld [vmem:[#allocation2 + $0x8] sm:$0xff]  ;;  %474 = vst.msk [vmem:[#allocation2 + $0x10] sm:$0xf0] %vm174_vm3, %v469_v2  ;;  %v522_v8 = vrot.slane %v1818_v4, 1  ;;  %v558_v13 = vrot.slane %v1818_v4, 2  ;;  %v481_v15 = vshrl.u32 %v1818_v4, 16 }
 0x21d   :  { %475 = vst.msk [vmem:[#allocation2 + $0x18] sm:$0xf] %vm176_vm2, %v469_v2  ;;  %v523_v6 = vrot.slane %v1816_v3, 1  ;;  %v488_v9 = vshll.u32 %v1816_v3, 16  ;;  %v492_v12 = vshrl.u32 %v1816_v3, 16  ;;  %v559_v14 = vrot.slane %v1816_v3, 2 }
 0x21e   :  { %v483_v17 = vshll.u32 %v1818_v4, 16  ;;  %v536_v24 = vrot.slane %v481_v15, 1 }
 0x21f   :  { %530 = vrot.lane.b32.xlu1 %v523_v6, %s1517_s21  ;;  %v524_v18 = vsel %vm227_vm4, %v522_v8, %v523_v6  ;;  %v490_v19 = vrot.slane %v488_v9, 1  ;;  %v539_v20 = vrot.slane %v492_v12, 1  ;;  %v540_v21 = vrot.slane %v488_v9, 2 }
 0x220   :  { %528 = vrot.lane.b32.xlu0 %v524_v18, %s1517_s21  ;;  %v560_v22 = vsel %vm265_vm8, %v558_v13, %v559_v14  ;;  %v596_v7 = vrot.slane %v559_v14, 3  ;;  %v485_v23 = vrot.slane %v483_v17, 1  ;;  %v537_v26 = vrot.slane %v483_v17, 2 }
 0x221   :  { %v494_v25 = vor.u32 %v492_v12, %v490_v19  ;;  %v595_v16 = vrot.slane %v560_v22, 3  ;;  %v541_v30 = vor.u32 %v540_v21, %v539_v20 }
 0x222   :  { %v486_v27 = vor.u32 %v485_v23, %v481_v15  ;;  %v538_v31 = vor.u32 %v537_v26, %v536_v24 }
 0x223   :  { %512 = vrot.lane.b32.xlu1 %v494_v25, %s1527_s8  ;;  %v597_v28 = vsel %vm303_vm9, %v595_v16, %v596_v7  ;;  %v478_v33 = vld [vmem:[#allocation2 + $0x10] sm:$0xff] }
 0x224   :  { %1198 = vmatprep.mubr.msk.bf16.mxu1 %vm272_vm7, %v597_v28  ;;  %v491_v29 = vsel %vm184_vm5, %v486_v27, %v490_v19  ;;  %v479_v32 = vld [vmem:[#allocation2 + $0x18] sm:$0xff]  ;;  %v498_v34 = vshll.u32 %v478_v33, 16  ;;  %v525_v36 = vrot.slane %v478_v33, 1  ;;  %v542_v37 = vsel %vm242_vm6, %v538_v31, %v541_v30 }
 0x225   :  { %510 = vrot.lane.b32.xlu0 %v491_v29, %s1527_s8  ;;  %v503_v11 = vshll.u32 %v479_v32, 16  ;;  %v526_v35 = vrot.slane %v479_v32, 1  ;;  %v507_v10 = vshrl.u32 %v479_v32, 16  ;;  %v496_v38 = vshrl.u32 %v478_v33, 16  ;;  %v1271_v27 = vld [vmem:[#allocation12] sm:$0xff]   ;;  %v1272_v28 = vld [vmem:[#allocation12 + $0x8] sm:$0xff]  }
 0x226   :  { %v500_v39 = vrot.slane %v498_v34, 1  ;;  %v544_v46 = vrot.slane %v498_v34, 2  ;;  %v561_v55 = vrot.slane %v478_v33, 2  ;;  %v562_v56 = vrot.slane %v479_v32, 2  ;;  %988 = vmatpush1.bf16.msra.mxu0 %v1271_v27  ;;  %v1273_v29 = vld [vmem:[#allocation12 + $0x10] sm:$0xff]   ;;  %v1275_v31 = vld [vmem:[#allocation12 + $0x20] sm:$0xff]  }
 0x227   :  { %552 = vrot.lane.b32.xlu1 %v541_v30, %s1528_s2  ;;  %v505_v40 = vrot.slane %v503_v11, 1  ;;  %v527_v41 = vsel %vm227_vm4, %v525_v36, %v526_v35  ;;  %v547_v42 = vrot.slane %v503_v11, 2  ;;  %v546_v44 = vrot.slane %v507_v10, 1  ;;  %989 = vmatprep.subr.bf16.mxu0 %v1526_v0  ;;  %v1274_v30 = vld [vmem:[#allocation12 + $0x18] sm:$0xff]  }
 0x228   :  { %v501_v43 = vor.u32 %v500_v39, %v496_v38  ;;  %v543_v45 = vrot.slane %v496_v38, 1  ;;  %v563_v62 = vsel %vm265_vm8, %v561_v55, %v562_v56  ;;  %v602_v9 = vrot.slane %v562_v56, 3  ;;  %v1187_v11 = vld [vmem:[#allocation11] ss:$0 sm:$0xff] }
 0x229   :  { %550 = vrot.lane.b32.xlu0 %v542_v37, %s1528_s2  ;;  %v509_v47 = vor.u32 %v507_v10, %v505_v40  ;;  %v548_v49 = vor.u32 %v547_v42, %v546_v44  ;;  %v601_v8 = vrot.slane %v563_v62, 3  ;;  %v1278_v42 = vld [vmem:[#allocation12 + $0x38] sm:$0xff]  }
 0x22a   :  { %v506_v48 = vsel %vm184_vm5, %v501_v43, %v505_v40  ;;  %v545_v50 = vor.u32 %v544_v46, %v543_v45  ;;  %990 = vmatpush1.bf16.msra.mxu0 %v1272_v28 }
 0x22b   :  { %534 = vrot.lane.b32.xlu1 %v526_v35, %s1517_s21  ;;  %v603_v14 = vsel %vm303_vm9, %v601_v8, %v602_v9  ;;  %991 = vmatprep.subr.bf16.mxu0 %v1526_v0 }
 0x22c   :  { %v549_v51 = vsel %vm242_vm6, %v545_v50, %v548_v49  ;;  %v1279_v50 = vld [vmem:[#allocation12 + $0x40] sm:$0xff]  }
 0x22d   :  { %532 = vrot.lane.b32.xlu0 %v527_v41, %s1517_s21 }
 0x22e   :  { %992 = vmatpush1.bf16.msra.mxu0 %v1273_v29 }
 0x22f   :  { %516 = vrot.lane.b32.xlu1 %v509_v47, %s1527_s8  ;;  %993 = vmatprep.subr.bf16.mxu0 %v1526_v0 }
 0x231   :  { %514 = vrot.lane.b32.xlu0 %v506_v48, %s1527_s8 }
 0x232   :  { %994 = vmatpush1.bf16.msra.mxu0 %v1274_v30 }
 0x233   :  { %556 = vrot.lane.b32.xlu1 %v548_v49, %s1528_s2  ;;  %995 = vmatprep.subr.bf16.mxu0 %v1526_v0 }
 0x235   :  { %554 = vrot.lane.b32.xlu0 %v549_v51, %s1528_s2 }
 0x236   :  { %996 = vmatpush1.bf16.msra.mxu0 %v1275_v31 }
 0x237   :  { %997 = vmatprep.subr.bf16.mxu0 %v1526_v0 }
 0x291   :  { %v531_v52 = vpop.permute.xlu1 %530 }
 0x292   :  { %v529_v53 = vpop.permute.xlu0 %528 }
 0x295   :  { %v513_v54 = vpop.permute.xlu1 %512 }
 0x296   :  { %v567_v57 = vsel %vm272_vm7, %v1816_v3, %v513_v54 }
 0x297   :  { %v511_v58 = vpop.permute.xlu0 %510  ;;  %v575_v60 = vsel %vm281_vm10, %v567_v57, %v531_v52 }
 0x298   :  { %v565_v59 = vsel %vm272_vm7, %v1818_v4, %v511_v58 }
 0x299   :  { %v553_v61 = vpop.permute.xlu1 %552  ;;  %v573_v2 = vsel %vm281_vm10, %v565_v59, %v529_v53  ;;  %v1280_v59 = vld [vmem:[#allocation12 + $0x48] sm:$0xff]  }
 0x29a   :  { %v583_v63 = vsel %vm290_vm11, %v575_v60, %v553_v61 }
 0x29b   :  { %v593_v1 = vrot.slane %v583_v63, 3  ;;  %v551_v5 = vpop.permute.xlu0 %550 }
 0x29c   :  { %v581_v6 = vsel %vm290_vm11, %v573_v2, %v551_v5 }
 0x29d   :  { %v592_v3 = vrot.slane %v581_v6, 3  ;;  %v535_v12 = vpop.permute.xlu1 %534 }
 0x29f   :  { %v533_v13 = vpop.permute.xlu0 %532  ;;  %v594_v4 = vsel %vm303_vm9, %v592_v3, %v593_v1 }
 0x2a0   :  { %732 = vmatmul.mubr.bf16.vlgmr.msra.gmra.mrb[0].mxu1 %v594_v4 }
 0x2a1   :  { %1199 = vmatprep.mubr.msk.bf16.mxu1 %vm272_vm7, %v603_v14  ;;  %v517_v15 = vpop.permute.xlu1 %516 }
 0x2a2   :  { %v571_v17 = vsel %vm272_vm7, %v479_v32, %v517_v15  ;;  %v1276_v32 = vld [vmem:[#allocation12 + $0x28] sm:$0xff]  }
 0x2a3   :  { %v515_v18 = vpop.permute.xlu0 %514  ;;  %v579_v20 = vsel %vm281_vm10, %v571_v17, %v535_v12  ;;  %998 = vmatpush1.bf16.msra.mxu0 %v1276_v32 }
 0x2a4   :  { %v569_v19 = vsel %vm272_vm7, %v478_v33, %v515_v18  ;;  %v1277_v33 = vld [vmem:[#allocation12 + $0x30] sm:$0xff]   ;;  %999 = vmatprep.subr.bf16.mxu0 %v1526_v0 }
 0x2a5   :  { %v557_v21 = vpop.permute.xlu1 %556  ;;  %v577_v23 = vsel %vm281_vm10, %v569_v19, %v533_v13 }
 0x2a6   :  { %v587_v22 = vsel %vm290_vm11, %v579_v20, %v557_v21 }
 0x2a7   :  { %v599_v7 = vrot.slane %v587_v22, 3  ;;  %v555_v24 = vpop.permute.xlu0 %554  ;;  %1000 = vmatpush1.bf16.msra.mxu0 %v1277_v33 }
 0x2a8   :  { %v585_v25 = vsel %vm290_vm11, %v577_v23, %v555_v24  ;;  %1001 = vmatprep.subr.bf16.mxu0 %v1526_v0 }
 0x2a9   :  { %v598_v16 = vrot.slane %v585_v25, 3 }
 0x2ab   :  { %v600_v26 = vsel %vm303_vm9, %v598_v16, %v599_v7  ;;  %1002 = vmatpush1.bf16.msra.mxu0 %v1278_v42 }
 0x2ac   :  { %740 = vmatmul.mubr.bf16.gmra.mrb[4].mxu1 %v600_v26  ;;  %1003 = vmatprep.subr.bf16.mxu0 %v1526_v0 }
 0x2af   :  { %1004 = vmatpush1.bf16.msra.mxu0 %v1279_v50 }
 0x2b0   :  { %1005 = vmatprep.subr.bf16.mxu0 %v1526_v0 }
 0x2b3   :  { %1006 = vmatpush1.bf16.msra.mxu0 %v1280_v59 }
 0x373   :  { %v733_v34 = vpop.f32.mrb[0].mxu1 }
 0x374   :  { %v734_v35 = vadd.f32 %v1187_v11, %v733_v34  ;;  %v735_v36 = vpop.f32.mrb[1].mxu1 }
 0x375   :  { %v736_v37 = vpop.f32.mrb[2].mxu1 }
 0x376   :  { %v737_v10 = vadd.f32 %v1187_v11, %v736_v37  ;;  %v738_v38 = vpop.f32.mrb[3].mxu1  ;;  %v748_v39 = vmax.f32 %v734_v35, 0.0 }
 0x378   :  { %v749_v40 = vmax.f32 %v737_v10, 0.0 }
 0x37a   :  { %v752_v41 = vpack.c.bf16 %v749_v40, %v748_v39 }
 0x37c   :  { %v756_v43 = vrot.slane %v752_v41, 4 }
 0x37e   :  { %760 = vst.msk [vmem:[#allocation2] sm:$0xf0] %vm174_vm3, %v756_v43 }
 0x37f   :  { %761 = vst.msk [vmem:[#allocation2 + $0x8] sm:$0xf] %vm176_vm2, %v756_v43  ;;  %v741_v44 = vpop.f32.mrb[4].mxu1 }
 0x380   :  { %v742_v45 = vadd.f32 %v1187_v11, %v741_v44  ;;  %v743_v46 = vpop.f32.mrb[5].mxu1 }
 0x381   :  { %v744_v47 = vpop.f32.mrb[6].mxu1 }
 0x382   :  { %v745_v48 = vadd.f32 %v1187_v11, %v744_v47  ;;  %v746_v49 = vpop.f32.mrb[7].mxu1  ;;  %v750_v51 = vmax.f32 %v742_v45, 0.0 }
 0x384   :  { %v751_v52 = vmax.f32 %v745_v48, 0.0 }
 0x385   :  { %v1882_v54 = vld [vmem:[#allocation2] sm:$0xff] }
 0x386   :  { %v1880_v53 = vld [vmem:[#allocation2 + $0x8] sm:$0xff]  ;;  %v753_v55 = vpack.c.bf16 %v751_v52, %v750_v51  ;;  %v810_v57 = vrot.slane %v1882_v54, 1  ;;  %v846_v61 = vrot.slane %v1882_v54, 2  ;;  %v769_v63 = vshrl.u32 %v1882_v54, 16 }
 0x387   :  { %v811_v56 = vrot.slane %v1880_v53, 1  ;;  %v776_v58 = vshll.u32 %v1880_v53, 16  ;;  %v780_v60 = vshrl.u32 %v1880_v53, 16  ;;  %v847_v62 = vrot.slane %v1880_v53, 2 }
 0x388   :  { %v757_v1 = vrot.slane %v753_v55, 4  ;;  %v771_v5 = vshll.u32 %v1882_v54, 16  ;;  %v824_v14 = vrot.slane %v769_v63, 1 }
 0x389   :  { %818 = vrot.lane.b32.xlu1 %v811_v56, %s1517_s21  ;;  %v812_v0 = vsel %vm227_vm4, %v810_v57, %v811_v56  ;;  %v778_v2 = vrot.slane %v776_v58, 1  ;;  %v848_v6 = vsel %vm265_vm8, %v846_v61, %v847_v62  ;;  %v884_v8 = vrot.slane %v847_v62, 3 }
 0x38a   :  { %816 = vrot.lane.b32.xlu0 %v812_v0, %s1517_s21  ;;  %v827_v9 = vrot.slane %v780_v60, 1  ;;  %v828_v3 = vrot.slane %v776_v58, 2  ;;  %762 = vst.msk [vmem:[#allocation2 + $0x10] sm:$0xf0] %vm174_vm3, %v757_v1  ;;  %v883_v13 = vrot.slane %v848_v6, 3  ;;  %v773_v4 = vrot.slane %v771_v5, 1 }
 0x38b   :  { %763 = vst.msk [vmem:[#allocation2 + $0x18] sm:$0xf] %vm176_vm2, %v757_v1  ;;  %v782_v12 = vor.u32 %v780_v60, %v778_v2  ;;  %v825_v15 = vrot.slane %v771_v5, 2 }
 0x38c   :  { %v885_v17 = vsel %vm303_vm9, %v883_v13, %v884_v8  ;;  %v774_v18 = vor.u32 %v773_v4, %v769_v63  ;;  %v829_v19 = vor.u32 %v828_v3, %v827_v9 }
 0x38d   :  { %800 = vrot.lane.b32.xlu1 %v782_v12, %s1527_s8  ;;  %1211 = vmatprep.mubr.msk.bf16.mxu0 %vm272_vm7, %v885_v17  ;;  %v826_v20 = vor.u32 %v825_v15, %v824_v14  ;;  %v1281_v15 = vld [vmem:[#allocation15] sm:$0xff]   ;;  %v1282_v17 = vld [vmem:[#allocation15 + $0x8] sm:$0xff]  }
 0x38e   :  { %v779_v21 = vsel %vm184_vm5, %v774_v18, %v778_v2  ;;  %1222 = vmatprep.subr.bf16.mxu1 %v1281_v15  ;;  %v1200_v18 = vld [vmem:[#allocation14] ss:$0 sm:$0xff] }
 0x38f   :  { %798 = vrot.lane.b32.xlu0 %v779_v21, %s1527_s8  ;;  %v830_v22 = vsel %vm242_vm6, %v826_v20, %v829_v19  ;;  %1223 = vmatpush3.bf16.msra.mxu1 %v1281_v15 }
 0x390   :  { %1224 = vmatprep.subr.bf16.mxu1 %v1282_v17 }
 0x391   :  { %840 = vrot.lane.b32.xlu1 %v829_v19, %s1528_s2  ;;  %v766_v23 = vld [vmem:[#allocation2 + $0x10] sm:$0xff] }
 0x392   :  { %v767_v7 = vld [vmem:[#allocation2 + $0x18] sm:$0xff]  ;;  %v813_v25 = vrot.slane %v766_v23, 1  ;;  %v784_v27 = vshrl.u32 %v766_v23, 16  ;;  %v786_v28 = vshll.u32 %v766_v23, 16  ;;  %v849_v44 = vrot.slane %v766_v23, 2 }
 0x393   :  { %v814_v24 = vrot.slane %v767_v7, 1  ;;  %v791_v16 = vshll.u32 %v767_v7, 16  ;;  %v795_v26 = vshrl.u32 %v767_v7, 16  ;;  %838 = vrot.lane.b32.xlu0 %v830_v22, %s1528_s2  ;;  %v850_v45 = vrot.slane %v767_v7, 2  ;;  %1225 = vmatpush3.bf16.msra.mxu1 %v1282_v17 }
 0x394   :  { %v788_v31 = vrot.slane %v786_v28, 1  ;;  %v831_v34 = vrot.slane %v784_v27, 1  ;;  %v832_v35 = vrot.slane %v786_v28, 2 }
 0x395   :  { %822 = vrot.lane.b32.xlu1 %v814_v24, %s1517_s21  ;;  %v815_v29 = vsel %vm227_vm4, %v813_v25, %v814_v24  ;;  %v793_v30 = vrot.slane %v791_v16, 1  ;;  %v834_v32 = vrot.slane %v795_v26, 1  ;;  %v835_v11 = vrot.slane %v791_v16, 2 }
 0x396   :  { %v789_v36 = vor.u32 %v788_v31, %v784_v27  ;;  %v833_v38 = vor.u32 %v832_v35, %v831_v34  ;;  %v851_v51 = vsel %vm265_vm8, %v849_v44, %v850_v45  ;;  %v890_v59 = vrot.slane %v850_v45, 3  ;;  %v1213_v45 = vld [vmem:[#allocation17] ss:$0 sm:$0xff] }
 0x397   :  { %v797_v33 = vor.u32 %v795_v26, %v793_v30  ;;  %820 = vrot.lane.b32.xlu0 %v815_v29, %s1517_s21  ;;  %v836_v10 = vor.u32 %v835_v11, %v834_v32  ;;  %v889_v58 = vrot.slane %v851_v51, 3  ;;  %s1529_s21 = smov [#allocation18]  }
 0x398   :  { %v794_v37 = vsel %vm184_vm5, %v789_v36, %v793_v30  ;;  %s1154_s20 = sshll.u32 %s1529_s21, 4  ;;  %s1155_s20 = int_to_ptr.vmem [resolvable:$true] %s1154_s20 }
 0x399   :  { %804 = vrot.lane.b32.xlu1 %v797_v33, %s1527_s8  ;;  %v837_v39 = vsel %vm242_vm6, %v833_v38, %v836_v10  ;;  %v891_v62 = vsel %vm303_vm9, %v889_v58, %v890_v59  ;;  %s1481_s17 = scalar_lea.vmem %s1155_s20, 512  ;;  %p1486_p3 = scmp.lt.s32.totalorder %s1155_s20, %s1155_s20 }
 0x39a   :  { %p1482_p2 = scmp.ne.s32.totalorder %s1155_s20, %s1481_s17  ;;  %p1487_p4 = scmp.lt.s32.totalorder %s1481_s17, %s1481_s17 }
 0x39b   :  { %802 = vrot.lane.b32.xlu0 %v794_v37, %s1527_s8 }
 0x39c   :  { %p1488_p5 = por %p1487_p4, %p1486_p3 }
 0x39d   :  { %844 = vrot.lane.b32.xlu1 %v836_v10, %s1528_s2 }
 0x39e   :  { %p1489_p6 = pnand %p1488_p5, %p1482_p2 }
 0x39f   :  { %842 = vrot.lane.b32.xlu0 %v837_v39, %s1528_s2 }
 0x3fb   :  { %v819_v40 = vpop.permute.xlu1 %818 }
 0x3fc   :  { %v817_v41 = vpop.permute.xlu0 %816 }
 0x3ff   :  { %v801_v42 = vpop.permute.xlu1 %800 }
 0x400   :  { %v855_v43 = vsel %vm272_vm7, %v1880_v53, %v801_v42 }
 0x401   :  { %v799_v46 = vpop.permute.xlu0 %798  ;;  %v863_v48 = vsel %vm281_vm10, %v855_v43, %v819_v40 }
 0x402   :  { %v853_v47 = vsel %vm272_vm7, %v1882_v54, %v799_v46 }
 0x403   :  { %v841_v49 = vpop.permute.xlu1 %840  ;;  %v861_v55 = vsel %vm281_vm10, %v853_v47, %v817_v41 }
 0x404   :  { %v871_v50 = vsel %vm290_vm11, %v863_v48, %v841_v49 }
 0x405   :  { %v881_v52 = vrot.slane %v871_v50, 3  ;;  %v839_v56 = vpop.permute.xlu0 %838 }
 0x406   :  { %v869_v57 = vsel %vm290_vm11, %v861_v55, %v839_v56 }
 0x407   :  { %v823_v53 = vpop.permute.xlu1 %822  ;;  %v880_v60 = vrot.slane %v869_v57, 3 }
 0x409   :  { %v821_v61 = vpop.permute.xlu0 %820  ;;  %v882_v54 = vsel %vm303_vm9, %v880_v60, %v881_v52 }
 0x40a   :  { %1020 = vmatmul.mubr.bf16.vlgmr.msra.gmra.mrb[8].mxu0 %v882_v54 }
 0x40b   :  { %v805_v63 = vpop.permute.xlu1 %804  ;;  %1212 = vmatprep.mubr.msk.bf16.mxu0 %vm272_vm7, %v891_v62 }
 0x40c   :  { %v859_v1 = vsel %vm272_vm7, %v767_v7, %v805_v63 }
 0x40d   :  { %v803_v0 = vpop.permute.xlu0 %802  ;;  %v867_v5 = vsel %vm281_vm10, %v859_v1, %v823_v53 }
 0x40e   :  { %v857_v2 = vsel %vm272_vm7, %v766_v23, %v803_v0 }
 0x40f   :  { %v845_v6 = vpop.permute.xlu1 %844  ;;  %v865_v3 = vsel %vm281_vm10, %v857_v2, %v821_v61 }
 0x410   :  { %v875_v8 = vsel %vm290_vm11, %v867_v5, %v845_v6 }
 0x411   :  { %v887_v9 = vrot.slane %v875_v8, 3  ;;  %v843_v12 = vpop.permute.xlu0 %842 }
 0x412   :  { %v873_v13 = vsel %vm290_vm11, %v865_v3, %v843_v12 }
 0x413   :  { %v886_v4 = vrot.slane %v873_v13, 3 }
 0x415   :  { %v888_v14 = vsel %vm303_vm9, %v886_v4, %v887_v9 }
 0x416   :  { %1028 = vmatmul.mubr.bf16.gmra.mrb[12].mxu0 %v888_v14 }
 0x4dd   :  { %v1021_v19 = vpop.f32.mrb[8].mxu0 }
 0x4de   :  { %v1022_v20 = vadd.f32 %v1200_v18, %v1021_v19  ;;  %v1023_v21 = vpop.f32.mrb[9].mxu0 }
 0x4df   :  { %v1024_v22 = vpop.f32.mrb[10].mxu0 }
 0x4e0   :  { %v1025_v7 = vadd.f32 %v1200_v18, %v1024_v22  ;;  %v1026_v23 = vpop.f32.mrb[11].mxu0  ;;  %v1036_v24 = vmax.f32 %v1022_v20, 0.0 }
 0x4e2   :  { %v1037_v25 = vmax.f32 %v1025_v7, 0.0 }
 0x4e4   :  { %v1040_v16 = vpack.c.bf16 %v1037_v25, %v1036_v24 }
 0x4e6   :  { %v1044_v26 = vrot.slane %v1040_v16, 4 }
 0x4e8   :  { %1048 = vst.msk [vmem:[#allocation2] sm:$0xf0] %vm174_vm3, %v1044_v26 }
 0x4e9   :  { %1049 = vst.msk [vmem:[#allocation2 + $0x8] sm:$0xf] %vm176_vm2, %v1044_v26  ;;  %v1029_v27 = vpop.f32.mrb[12].mxu0 }
 0x4ea   :  { %v1030_v28 = vadd.f32 %v1200_v18, %v1029_v27  ;;  %v1031_v29 = vpop.f32.mrb[13].mxu0 }
 0x4eb   :  { %v1032_v30 = vpop.f32.mrb[14].mxu0 }
 0x4ec   :  { %v1033_v31 = vadd.f32 %v1200_v18, %v1032_v30  ;;  %v1034_v32 = vpop.f32.mrb[15].mxu0  ;;  %v1038_v33 = vmax.f32 %v1030_v28, 0.0 }
 0x4ee   :  { %v1039_v11 = vmax.f32 %v1033_v31, 0.0 }
 0x4ef   :  { %v1052_v34 = vld [vmem:[#allocation2] sm:$0xf0] }
 0x4f0   :  { %v1053_v35 = vld [vmem:[#allocation2 + $0x8] sm:$0xf]  ;;  %v1041_v36 = vpack.c.bf16 %v1039_v11, %v1038_v33  ;;  %v1061_v37 = vrot.slane %v1052_v34, 4 }
 0x4f1   :  { %v1062_v10 = vrot.slane %v1053_v35, 4 }
 0x4f2   :  { %v1045_v38 = vrot.slane %v1041_v36, 4 }
 0x4f3   :  { %v1063_v39 = vsel %vm1060_vm12, %v1061_v37, %v1062_v10 }
 0x4f4   :  { %1226 = vmatprep.mubr.msk.bf16.mxu1 %vm272_vm7, %v1063_v39  ;;  %1050 = vst.msk [vmem:[#allocation2 + $0x10] sm:$0xf0] %vm174_vm3, %v1045_v38 }
 0x4f5   :  { %1051 = vst.msk [vmem:[#allocation2 + $0x18] sm:$0xf] %vm176_vm2, %v1045_v38 }
 0x4fb   :  { %v1054_v40 = vld [vmem:[#allocation2 + $0x10] sm:$0xf0] }
 0x4fc   :  { %v1055_v41 = vld [vmem:[#allocation2 + $0x18] sm:$0xf]  ;;  %v1064_v42 = vrot.slane %v1054_v40, 4 }
 0x4fd   :  { %v1065_v43 = vrot.slane %v1055_v41, 4 }
 0x4ff   :  { %v1066_v44 = vsel %vm1060_vm12, %v1064_v42, %v1065_v43 }
 0x500   :  { %1227 = vmatmul.mubr.msk.bf16.vlgmr.msra.gmra.mrb[8].mxu1 %vm272_vm7, %v1066_v44 }
 0x5d3   :  { %v1228_v46 = vpop.f32.mrb[8].mxu1 }
 0x5d4   :  { %v1139_v47 = vadd.f32 %v1228_v46, %v1213_v45  ;;  %v1130_v48 = vpop.f32.mrb[9].mxu1 }
 0x5d5   :  { %v1131_v49 = vadd.f32 %v1213_v45, %v1130_v48  ;;  %v1229_v50 = vpop.f32.mrb[10].mxu1 }
 0x5d6   :  { %1147 = vst.msk [vmem:[#allocation18 + $0x10] sm:$0xff] %vm272_vm7, %v1139_v47  ;;  %v1142_v51 = vadd.f32 %v1229_v50, %v1213_v45  ;;  %v1133_v52 = vpop.f32.mrb[11].mxu1 }
 0x5d7   :  { %1145 = vst.msk [vmem:[#allocation18] sm:$0xff] %vm272_vm7, %v1131_v49  ;;  %v1134_v55 = vadd.f32 %v1213_v45, %v1133_v52 }
 0x5d8   :  { %1148 = vst.msk [vmem:[#allocation18 + $0x18] sm:$0xff] %vm272_vm7, %v1142_v51 }
 0x5d9   :  { %1146 = vst.msk [vmem:[#allocation18 + $0x8] sm:$0xff] %vm272_vm7, %v1134_v55 }
 0x5da   :  { %1492 = shalt.err (!%p1489_p6)
}
 0x5db   :  { %s1493_s30 = scalar_lea.hbm %s1966_s9, 512 }
 0x5dc   :  { %p1494_p7 = scmp.ne.s32.totalorder %s1966_s9, %s1493_s30  ;;  %p1497_p8 = scmp.lt.u32.totalorder %s1493_s30, %s1966_s9 }
 0x5de   :  { %p1499_p9 = pnand %p1497_p8, %p1494_p7 }
 0x5e0   :  { %1502 = shalt.err (!%p1499_p9)
}
 0x5e1   :  { %s1530_s14 = smov 128   ;;  %s1531_s5 = smov 8  }
 0x5e2   :  { %1160 = dma.vmem_to_hbm [thread:$0]  %s1155_s20, 512, %s1966_s9, [#allocation5], %s1530_s14, %s1530_s14, %s1531_s5  }
 0x5e3   :  { %1513 = dma.done.wait [#allocation5], 512  }
 0x5e4   :  { %1514 = vsyncadd [#allocation5], 4294966784 }
 0x5e5   :  { %1164 = vsyncpa [#allocation4], 1 }
 0x5e6   :  { %1165 = vsyncpa [#allocation7], 1 }
 0x5e7   :  { %1166 = vsyncpa [#allocation10], 1 }
 0x5e8   :  { %1167 = vsyncpa [#allocation13], 1 }
 0x5e9   :  { %1168 = vsyncpa [#allocation16], 1 }
 0x5ea   :  { %1169 = vsyncpa [#allocation5], 1 }

// kernel: tpu_custom_call.1
= control target key start
LH: loop header
LB: loop body
LE: loop exit
PB: predicated region body
PF: predicated region fallthrough
CT: control target
= control target key end

     0   :  { %14 = vsyncpa [#allocation4], 0  ;;  %s1957_s0 = inlined_call_operand.hbm [shape: bf16[2,16,32], index: 0, kind: input, shape index: {}]   ;;  %s1958_s1 = inlined_call_operand.hbm [shape: bf16[160,32], index: 1, kind: input, shape index: {}]   ;;  %s1959_s2 = inlined_call_operand.hbm [shape: f32[1,32], index: 2, kind: input, shape index: {}]   ;;  %s1960_s3 = inlined_call_operand.hbm [shape: bf16[160,32], index: 3, kind: input, shape index: {}]   ;;  %s1961_s4 = inlined_call_operand.hbm [shape: f32[1,32], index: 4, kind: input, shape index: {}]   ;;  %s1962_s5 = inlined_call_operand.hbm [shape: bf16[160,32], index: 5, kind: input, shape index: {}]   ;;  %s1963_s6 = inlined_call_operand.hbm [shape: f32[1,32], index: 6, kind: input, shape index: {}]   ;;  %s1964_s7 = inlined_call_operand.hbm [shape: bf16[32,32], index: 7, kind: input, shape index: {}]   ;;  %s1965_s8 = inlined_call_operand.hbm [shape: f32[1,32], index: 8, kind: input, shape index: {}]   ;;  %s1966_s9 = inlined_call_operand.hbm [shape: f32[2,16,32], index: 9, kind: output, shape index: {}]  }
   0x1   :  { %15 = vsyncpa [#allocation7], 0 }
   0x2   :  { %16 = vsyncpa [#allocation10], 0 }
   0x3   :  { %17 = vsyncpa [#allocation13], 0 }
   0x4   :  { %18 = vsyncpa [#allocation16], 0 }
   0x5   :  { %19 = vsyncpa [#allocation5], 0  ;;  %s1515_s30 = smov [#allocation6]   ;;  %s1516_s11 = smov [#allocation9]  }
   0x6   :  { %s37_s10 = sshll.u32 %s1515_s30, 4  ;;  %s59_s12 = sshll.u32 %s1516_s11, 4  ;;  %s38_s10 = int_to_ptr.vmem [resolvable:$true] %s37_s10  ;;  %s1582_s12 = int_to_ptr.vmem [resolvable:$true] %s59_s12 }
   0x7   :  { %s1283_s15 = scalar_lea.hbm %s1958_s1, 1280 }
   0x8   :  { %p1284_p0 = scmp.ne.s32.totalorder %s1958_s1, %s1283_s15  ;;  %p1287_p1 = scmp.lt.u32.totalorder %s1283_s15, %s1958_s1 }
   0xa   :  { %p1289_p2 = pnand %p1287_p1, %p1284_p0 }
   0xc   :  { %1292 = shalt.err (!%p1289_p2)
}
   0xd   :  { %s1293_s20 = scalar_lea.vmem %s38_s10, 1280  ;;  %p1298_p4 = scmp.lt.s32.totalorder %s38_s10, %s38_s10 }
   0xe   :  { %p1294_p3 = scmp.ne.s32.totalorder %s38_s10, %s1293_s20  ;;  %p1299_p5 = scmp.lt.s32.totalorder %s1293_s20, %s1293_s20 }
  0x10   :  { %p1300_p6 = por %p1299_p5, %p1298_p4 }
  0x12   :  { %p1301_p7 = pnand %p1300_p6, %p1294_p3 }
  0x14   :  { %1304 = shalt.err (!%p1301_p7)
}
  0x15   :  { %s1517_s21 = smov 64   ;;  %s1518_s22 = smov 4  }
  0x16   :  { %43 = dma.hbm_to_vmem [thread:$0]  %s1958_s1, 1280, %s38_s10, [#allocation7], %s1517_s21, %s1517_s21, %s1518_s22  }
  0x17   :  { %s1305_s27 = scalar_lea.hbm %s1960_s3, 1280 }
  0x18   :  { %p1306_p8 = scmp.ne.s32.totalorder %s1960_s3, %s1305_s27  ;;  %p1309_p9 = scmp.lt.u32.totalorder %s1305_s27, %s1960_s3 }
  0x1a   :  { %p1311_p10 = pnand %p1309_p9, %p1306_p8 }
  0x1c   :  { %1314 = shalt.err (!%p1311_p10)
}
  0x1d   :  { %s1315_s13 = scalar_lea.vmem %s1582_s12, 1280  ;;  %p1320_p12 = scmp.lt.s32.totalorder %s1582_s12, %s1582_s12 }
  0x1e   :  { %p1316_p11 = scmp.ne.s32.totalorder %s1582_s12, %s1315_s13  ;;  %p1321_p13 = scmp.lt.s32.totalorder %s1315_s13, %s1315_s13 }
  0x20   :  { %p1322_p0 = por %p1321_p13, %p1320_p12 }
  0x22   :  { %p1323_p1 = pnand %p1322_p0, %p1316_p11 }
  0x24   :  { %1326 = shalt.err (!%p1323_p1)
}
  0x25   :  { %65 = dma.hbm_to_vmem [thread:$0]  %s1960_s3, 1280, %s1582_s12, [#allocation10], %s1517_s21, %s1517_s21, %s1518_s22  }
  0x26   :  { %s1519_s14 = smov [#allocation12]   ;;  %s1520_s16 = smov [#allocation15]  }
  0x27   :  { %s81_s15 = sshll.u32 %s1519_s14, 4  ;;  %s103_s17 = sshll.u32 %s1520_s16, 4  ;;  %s82_s15 = int_to_ptr.vmem [resolvable:$true] %s81_s15  ;;  %s1619_s17 = int_to_ptr.vmem [resolvable:$true] %s103_s17 }
  0x28   :  { %s1327_s20 = scalar_lea.hbm %s1962_s5, 1280 }
  0x29   :  { %p1328_p2 = scmp.ne.s32.totalorder %s1962_s5, %s1327_s20  ;;  %p1331_p3 = scmp.lt.u32.totalorder %s1327_s20, %s1962_s5 }
  0x2b   :  { %p1333_p4 = pnand %p1331_p3, %p1328_p2 }
  0x2d   :  { %1336 = shalt.err (!%p1333_p4)
}
  0x2e   :  { %s1337_s3 = scalar_lea.vmem %s82_s15, 1280  ;;  %p1342_p6 = scmp.lt.s32.totalorder %s82_s15, %s82_s15 }
  0x2f   :  { %p1338_p5 = scmp.ne.s32.totalorder %s82_s15, %s1337_s3  ;;  %p1343_p7 = scmp.lt.s32.totalorder %s1337_s3, %s1337_s3 }
  0x31   :  { %p1344_p8 = por %p1343_p7, %p1342_p6 }
  0x33   :  { %p1345_p9 = pnand %p1344_p8, %p1338_p5 }
  0x35   :  { %1348 = shalt.err (!%p1345_p9)
}
  0x36   :  { %87 = dma.hbm_to_vmem [thread:$0]  %s1962_s5, 1280, %s82_s15, [#allocation13], %s1517_s21, %s1517_s21, %s1518_s22  }
  0x37   :  { %s1349_s30 = scalar_lea.hbm %s1964_s7, 256 }
  0x38   :  { %p1350_p10 = scmp.ne.s32.totalorder %s1964_s7, %s1349_s30  ;;  %p1353_p11 = scmp.lt.u32.totalorder %s1349_s30, %s1964_s7 }
  0x3a   :  { %p1355_p12 = pnand %p1353_p11, %p1350_p10 }
  0x3c   :  { %1358 = shalt.err (!%p1355_p12)
}
  0x3d   :  { %s1359_s14 = scalar_lea.vmem %s1619_s17, 256  ;;  %p1364_p0 = scmp.lt.s32.totalorder %s1619_s17, %s1619_s17 }
  0x3e   :  { %p1360_p13 = scmp.ne.s32.totalorder %s1619_s17, %s1359_s14  ;;  %p1365_p1 = scmp.lt.s32.totalorder %s1359_s14, %s1359_s14 }
  0x40   :  { %p1366_p2 = por %p1365_p1, %p1364_p0 }
  0x42   :  { %p1367_p3 = pnand %p1366_p2, %p1360_p13 }
  0x44   :  { %1370 = shalt.err (!%p1367_p3)
}
  0x45   :  { %109 = dma.hbm_to_vmem [thread:$0]  %s1964_s7, 256, %s1619_s17, [#allocation16], %s1517_s21, %s1517_s21, %s1518_s22  }
  0x46   :  { %s1521_s16 = smov [#allocation3]   ;;  %s1522_s19 = smov [#allocation8]  }
  0x47   :  { %s25_s18 = sshll.u32 %s1521_s16, 4  ;;  %s50_s20 = sshll.u32 %s1522_s19, 4  ;;  %s26_s18 = int_to_ptr.vmem [resolvable:$true] %s25_s18  ;;  %s51_s20 = int_to_ptr.vmem [resolvable:$true] %s50_s20 }
  0x48   :  { %s1371_s25 = scalar_lea.hbm %s1957_s0, 256 }
  0x49   :  { %p1372_p4 = scmp.ne.s32.totalorder %s1957_s0, %s1371_s25  ;;  %p1375_p5 = scmp.lt.u32.totalorder %s1371_s25, %s1957_s0 }
  0x4b   :  { %p1377_p6 = pnand %p1375_p5, %p1372_p4 }
  0x4d   :  { %1380 = shalt.err (!%p1377_p6)
}
  0x4e   :  { %s1381_s7 = scalar_lea.vmem %s26_s18, 256  ;;  %p1386_p8 = scmp.lt.s32.totalorder %s26_s18, %s26_s18 }
  0x4f   :  { %p1382_p7 = scmp.ne.s32.totalorder %s26_s18, %s1381_s7  ;;  %p1387_p9 = scmp.lt.s32.totalorder %s1381_s7, %s1381_s7 }
  0x51   :  { %p1388_p10 = por %p1387_p9, %p1386_p8 }
  0x53   :  { %p1389_p11 = pnand %p1388_p10, %p1382_p7 }
  0x55   :  { %1392 = shalt.err (!%p1389_p11)
}
  0x56   :  { %31 = dma.hbm_to_vmem [thread:$0]  %s1957_s0, 256, %s26_s18, [#allocation4], %s1517_s21, %s1517_s21, %s1518_s22  }
  0x57   :  { %s1393_s11 = scalar_lea.hbm %s1959_s2, 16 }
  0x58   :  { %p1394_p12 = scmp.ne.s32.totalorder %s1959_s2, %s1393_s11  ;;  %p1397_p13 = scmp.lt.u32.totalorder %s1393_s11, %s1959_s2 }
  0x5a   :  { %p1399_p0 = pnand %p1397_p13, %p1394_p12 }
  0x5c   :  { %1402 = shalt.err (!%p1399_p0)
}
  0x5d   :  { %s1403_s5 = scalar_lea.vmem %s51_s20, 16  ;;  %s1407_s15 = scalar_lea.vmem %s51_s20, 32 }
  0x5e   :  { %p1404_p1 = scmp.ne.s32.totalorder %s51_s20, %s1403_s5  ;;  %p1408_p2 = scmp.lt.s32.totalorder %s51_s20, %s51_s20 }
  0x5f   :  { %p1409_p3 = scmp.lt.s32.totalorder %s1407_s15, %s1403_s5 }
  0x61   :  { %p1410_p4 = por %p1409_p3, %p1408_p2 }
  0x63   :  { %p1411_p5 = pnand %p1410_p4, %p1404_p1 }
  0x65   :  { %1414 = shalt.err (!%p1411_p5)
}
  0x66   :  { %53 = dma.hbm_to_vmem [thread:$0]  %s1959_s2, 16, %s51_s20, [#allocation7]  }
  0x67   :  { %s1523_s16 = smov [#allocation11]   ;;  %s1524_s19 = smov [#allocation14]  }
  0x68   :  { %s72_s18 = sshll.u32 %s1523_s16, 4  ;;  %s94_s23 = sshll.u32 %s1524_s19, 4  ;;  %s73_s18 = int_to_ptr.vmem [resolvable:$true] %s72_s18  ;;  %s95_s23 = int_to_ptr.vmem [resolvable:$true] %s94_s23 }
  0x69   :  { %s1415_s26 = scalar_lea.hbm %s1961_s4, 16 }
  0x6a   :  { %p1416_p6 = scmp.ne.s32.totalorder %s1961_s4, %s1415_s26  ;;  %p1419_p7 = scmp.lt.u32.totalorder %s1415_s26, %s1961_s4 }
  0x6c   :  { %p1421_p8 = pnand %p1419_p7, %p1416_p6 }
  0x6e   :  { %1424 = shalt.err (!%p1421_p8)
}
  0x6f   :  { %s1425_s2 = scalar_lea.vmem %s73_s18, 16  ;;  %s1429_s20 = scalar_lea.vmem %s73_s18, 32 }
  0x70   :  { %p1426_p9 = scmp.ne.s32.totalorder %s73_s18, %s1425_s2  ;;  %p1430_p10 = scmp.lt.s32.totalorder %s73_s18, %s73_s18 }
  0x71   :  { %p1431_p11 = scmp.lt.s32.totalorder %s1429_s20, %s1425_s2 }
  0x73   :  { %p1432_p12 = por %p1431_p11, %p1430_p10 }
  0x75   :  { %p1433_p13 = pnand %p1432_p12, %p1426_p9 }
  0x77   :  { %1436 = shalt.err (!%p1433_p13)
}
  0x78   :  { %75 = dma.hbm_to_vmem [thread:$0]  %s1961_s4, 16, %s73_s18, [#allocation10]  }
  0x79   :  { %s1437_s11 = scalar_lea.hbm %s1963_s6, 16 }
  0x7a   :  { %p1438_p0 = scmp.ne.s32.totalorder %s1963_s6, %s1437_s11  ;;  %p1441_p1 = scmp.lt.u32.totalorder %s1437_s11, %s1963_s6 }
  0x7c   :  { %p1443_p2 = pnand %p1441_p1, %p1438_p0 }
  0x7e   :  { %1446 = shalt.err (!%p1443_p2)
}
  0x7f   :  { %s1447_s5 = scalar_lea.vmem %s95_s23, 16  ;;  %s1451_s15 = scalar_lea.vmem %s95_s23, 32 }
  0x80   :  { %p1448_p3 = scmp.ne.s32.totalorder %s95_s23, %s1447_s5  ;;  %p1452_p4 = scmp.lt.s32.totalorder %s95_s23, %s95_s23 }
  0x81   :  { %p1453_p5 = scmp.lt.s32.totalorder %s1451_s15, %s1447_s5 }
  0x83   :  { %p1454_p6 = por %p1453_p5, %p1452_p4 }
  0x85   :  { %p1455_p7 = pnand %p1454_p6, %p1448_p3 }
  0x87   :  { %1458 = shalt.err (!%p1455_p7)
}
  0x88   :  { %97 = dma.hbm_to_vmem [thread:$0]  %s1963_s6, 16, %s95_s23, [#allocation13]  }
  0x89   :  { %s1525_s22 = smov [#allocation17]   ;;  %s1459_s24 = scalar_lea.hbm %s1965_s8, 16 }
  0x8a   :  { %s116_s16 = sshll.u32 %s1525_s22, 4  ;;  %p1460_p8 = scmp.ne.s32.totalorder %s1965_s8, %s1459_s24  ;;  %s117_s16 = int_to_ptr.vmem [resolvable:$true] %s116_s16 }
  0x8b   :  { %p1463_p9 = scmp.lt.u32.totalorder %s1459_s24, %s1965_s8 }
  0x8d   :  { %p1465_p10 = pnand %p1463_p9, %p1460_p8 }
  0x8f   :  { %1468 = shalt.err (!%p1465_p10)
}
  0x90   :  { %s1469_s27 = scalar_lea.vmem %s117_s16, 16  ;;  %s1473_s6 = scalar_lea.vmem %s117_s16, 32 }
  0x91   :  { %p1470_p11 = scmp.ne.s32.totalorder %s117_s16, %s1469_s27  ;;  %p1474_p12 = scmp.lt.s32.totalorder %s117_s16, %s117_s16 }
  0x92   :  { %p1475_p13 = scmp.lt.s32.totalorder %s1473_s6, %s1469_s27 }
  0x94   :  { %p1476_p0 = por %p1475_p13, %p1474_p12 }
  0x96   :  { %p1477_p1 = pnand %p1476_p0, %p1470_p11 }
  0x98   :  { %1480 = shalt.err (!%p1477_p1)
}
  0x99   :  { %119 = dma.hbm_to_vmem [thread:$0]  %s1965_s8, 16, %s117_s16, [#allocation16]  }
  0x9a   :  { %1503 = dma.done.wait [#allocation4], 256  }
  0x9b   :  { %1504 = vsyncadd [#allocation4], 4294967040 }
  0x9c   :  { %1505 = dma.done.wait [#allocation7], 1296  }
  0x9d   :  { %1506 = vsyncadd [#allocation7], 4294966000 }
  0x9e   :  { %1507 = dma.done.wait [#allocation10], 1296  }
  0x9f   :  { %1508 = vsyncadd [#allocation10], 4294966000 }
  0xa0   :  { %1509 = dma.done.wait [#allocation13], 1296  }
  0xa1   :  { %1510 = vsyncadd [#allocation13], 4294966000 }
  0xa2   :  { %1511 = dma.done.wait [#allocation16], 272  }
  0xa3   :  { %1512 = vsyncadd [#allocation16], 4294967024  ;;  %vm151_vm0 = vcmask 258052   ;;  %vm148_vm1 = vcmask 257027   ;;  %v1526_v0 = vmov 0   ;;  %vm176_vm2 = vcmask 257024  }
  0xa4   :  { %152 = vst.msk [vmem:[#allocation2 + $0x8] sm:$0x10] %vm151_vm0, %v1526_v0  ;;  %153 = vst.msk [vmem:[#allocation2 + $0x18] sm:$0x10] %vm151_vm0, %v1526_v0  ;;  %411 = vmatprep.subr.bf16.mxu0 %v1526_v0  ;;  %699 = vmatprep.subr.bf16.mxu1 %v1526_v0  ;;  %vm174_vm3 = vcmask 261124   ;;  %v1251_v5 = vld [vmem:[#allocation6] sm:$0xff]  }
  0xa5   :  { %150 = vst.msk [vmem:[#allocation2 + $0x10] sm:$0x8] %vm148_vm1, %v1526_v0  ;;  %149 = vst.msk [vmem:[#allocation2] sm:$0x8] %vm148_vm1, %v1526_v0  ;;  %v1247_v1 = vld [vmem:[#allocation3 + $0x4] ss:$0 sps:$4 sm:$0xff]   ;;  %412 = vmatpush1.bf16.msra.mxu0 %v1251_v5 }
  0xa6   :  { %v1248_v2 = vld [vmem:[#allocation3 + $0x8] ss:$0 sps:$4 sm:$0xff]   ;;  %v1249_v3 = vld [vmem:[#allocation3 + $0xc] ss:$0 sps:$4 sm:$0xff]   ;;  %177 = vst.msk [vmem:[#allocation2 + $0x8] sm:$0xf] %vm176_vm2, %v1247_v1  ;;  %413 = vmatprep.subr.bf16.mxu0 %v1526_v0 }
  0xa7   :  { %v1250_v4 = vld [vmem:[#allocation3] ss:$0 sps:$4 sm:$0xff]   ;;  %178 = vst.msk [vmem:[#allocation2 + $0x10] sm:$0xf0] %vm174_vm3, %v1248_v2  ;;  %v1252_v6 = vld [vmem:[#allocation6 + $0x8] sm:$0xff]   ;;  %vm227_vm4 = vcmask 1046528  }
  0xa8   :  { %179 = vst.msk [vmem:[#allocation2 + $0x18] sm:$0xf] %vm176_vm2, %v1249_v3  ;;  %v1253_v8 = vld [vmem:[#allocation6 + $0x10] sm:$0xff]   ;;  %vm184_vm5 = vsmask.f32 7424  ;;  %v1254_v23 = vld [vmem:[#allocation6 + $0x18] sm:$0xff]  }
  0xa9   :  { %175 = vst.msk [vmem:[#allocation2] sm:$0xf0] %vm174_vm3, %v1250_v4  ;;  %414 = vmatpush1.bf16.msra.mxu0 %v1252_v6  ;;  %vm242_vm6 = vsmask.f32 6400  ;;  %v1255_v34 = vld [vmem:[#allocation6 + $0x20] sm:$0xff]   ;;  %vm272_vm7 = vcmask 261120  }
  0xaa   :  { %415 = vmatprep.subr.bf16.mxu0 %v1526_v0  ;;  %s1527_s8 = smov 32   ;;  %vm265_vm8 = vcmask 1045504   ;;  %v1256_v41 = vld [vmem:[#allocation6 + $0x28] sm:$0xff]   ;;  %vm303_vm9 = vcmask 1044480   ;;  %s1528_s2 = smov 96   ;;  %v1257_v55 = vld [vmem:[#allocation6 + $0x30] sm:$0xff]  }
  0xab   :  { %v1258_v59 = vld [vmem:[#allocation6 + $0x38] sm:$0xff]   ;;  %v1259_v61 = vld [vmem:[#allocation6 + $0x40] sm:$0xff]   ;;  %v1260_v62 = vld [vmem:[#allocation6 + $0x48] sm:$0xff]   ;;  %vm281_vm10 = vcmask 523264   ;;  %vm290_vm11 = vcmask 785408   ;;  %vm1060_vm12 = vcmask 1043456  }
  0xad   :  { %v1730_v7 = vld [vmem:[#allocation2 + $0x8] sm:$0xff]  ;;  %416 = vmatpush1.bf16.msra.mxu0 %v1253_v8 }
  0xae   :  { %v229_v9 = vrot.slane %v1730_v7, 1  ;;  %v1733_v10 = vld [vmem:[#allocation2 + $0x10] sm:$0xff]  ;;  %v193_v12 = vshll.u32 %v1730_v7, 16  ;;  %v197_v13 = vshrl.u32 %v1730_v7, 16  ;;  %417 = vmatprep.subr.bf16.mxu0 %v1526_v0  ;;  %v267_v42 = vrot.slane %v1730_v7, 2 }
  0xaf   :  { %v1735_v11 = vld [vmem:[#allocation2 + $0x18] sm:$0xff]  ;;  %v231_v14 = vrot.slane %v1733_v10, 1  ;;  %v203_v31 = vshll.u32 %v1733_v10, 16  ;;  %v201_v37 = vshrl.u32 %v1733_v10, 16  ;;  %v269_v4 = vrot.slane %v1733_v10, 2 }
  0xb0   :  { %v232_v15 = vrot.slane %v1735_v11, 1  ;;  %v1742_v16 = vld [vmem:[#allocation2] sm:$0xff]  ;;  %236 = vrot.lane.b32.xlu1 %v229_v9, %s1517_s21  ;;  %v195_v17 = vrot.slane %v193_v12, 1  ;;  %v246_v22 = vrot.slane %v197_v13, 1  ;;  %v247_v26 = vrot.slane %v193_v12, 2 }
  0xb1   :  { %v186_v18 = vshrl.u32 %v1742_v16, 16  ;;  %v188_v19 = vshll.u32 %v1742_v16, 16  ;;  %v228_v21 = vrot.slane %v1742_v16, 1  ;;  %v208_v30 = vshll.u32 %v1735_v11, 16  ;;  %418 = vmatpush1.bf16.msra.mxu0 %v1254_v23 }
  0xb2   :  { %v233_v20 = vsel %vm227_vm4, %v231_v14, %v232_v15  ;;  %v199_v24 = vor.u32 %v197_v13, %v195_v17  ;;  %v212_v33 = vshrl.u32 %v1735_v11, 16  ;;  %v266_v35 = vrot.slane %v1742_v16, 2  ;;  %419 = vmatprep.subr.bf16.mxu0 %v1526_v0 }
  0xb3   :  { %238 = vrot.lane.b32.xlu0 %v233_v20, %s1517_s21  ;;  %v190_v25 = vrot.slane %v188_v19, 1  ;;  %v243_v27 = vrot.slane %v186_v18, 1  ;;  %v244_v28 = vrot.slane %v188_v19, 2  ;;  %v230_v32 = vsel %vm227_vm4, %v228_v21, %v229_v9 }
  0xb4   :  { %240 = vrot.lane.b32.xlu1 %v232_v15, %s1517_s21  ;;  %v248_v36 = vor.u32 %v247_v26, %v246_v22  ;;  %v205_v40 = vrot.slane %v203_v31, 1  ;;  %v210_v43 = vrot.slane %v208_v30, 1  ;;  %v253_v44 = vrot.slane %v212_v33, 1 }
  0xb5   :  { %v191_v29 = vor.u32 %v190_v25, %v186_v18  ;;  %v245_v39 = vor.u32 %v244_v28, %v243_v27  ;;  %420 = vmatpush1.bf16.msra.mxu0 %v1255_v34  ;;  %v268_v45 = vsel %vm265_vm8, %v266_v35, %v267_v42  ;;  %v308_v46 = vrot.slane %v267_v42, 3  ;;  %v1267_v42 = vld [vmem:[#allocation9 + $0x30] sm:$0xff]  }
  0xb6   :  { %v254_v47 = vrot.slane %v208_v30, 2  ;;  %421 = vmatprep.subr.bf16.mxu0 %v1526_v0  ;;  %v307_v48 = vrot.slane %v268_v45, 3  ;;  %v206_v50 = vor.u32 %v205_v40, %v201_v37  ;;  %v250_v51 = vrot.slane %v201_v37, 1  ;;  %v1261_v37 = vld [vmem:[#allocation9] sm:$0xff]  }
  0xb7   :  { %217 = vrot.lane.b32.xlu0 %v199_v24, %s1527_s8  ;;  %v196_v38 = vsel %vm184_vm5, %v191_v29, %v195_v17  ;;  %v249_v49 = vsel %vm242_vm6, %v245_v39, %v248_v36  ;;  %v251_v52 = vrot.slane %v203_v31, 2  ;;  %v214_v53 = vor.u32 %v212_v33, %v210_v43  ;;  %700 = vmatpush1.bf16.msra.mxu1 %v1261_v37  ;;  %v1264_v39 = vld [vmem:[#allocation9 + $0x18] sm:$0xff]   ;;  %v1265_v40 = vld [vmem:[#allocation9 + $0x20] sm:$0xff]  }
  0xb8   :  { %234 = vrot.lane.b32.xlu1 %v230_v32, %s1517_s21  ;;  %v309_v54 = vsel %vm303_vm9, %v307_v48, %v308_v46  ;;  %v211_v56 = vsel %vm184_vm5, %v206_v50, %v210_v43  ;;  %v255_v57 = vor.u32 %v254_v47, %v253_v44  ;;  %v270_v5 = vrot.slane %v1735_v11, 2  ;;  %701 = vmatprep.subr.bf16.mxu1 %v1526_v0  ;;  %v1174_v43 = vld [vmem:[#allocation8] ss:$0 sm:$0xff] }
  0xb9   :  { %422 = vmatpush1.bf16.msra.mxu0 %v1256_v41  ;;  %1185 = vmatprep.mubr.msk.bf16.mxu0 %vm272_vm7, %v309_v54  ;;  %v252_v58 = vor.u32 %v251_v52, %v250_v51  ;;  %v1266_v41 = vld [vmem:[#allocation9 + $0x28] sm:$0xff]   ;;  %v1268_v54 = vld [vmem:[#allocation9 + $0x38] sm:$0xff]  }
  0xba   :  { %423 = vmatprep.subr.bf16.mxu0 %v1526_v0  ;;  %v271_v12 = vsel %vm265_vm8, %v269_v4, %v270_v5  ;;  %v314_v19 = vrot.slane %v270_v5, 3  ;;  %v1270_v5 = vld [vmem:[#allocation9 + $0x48] sm:$0xff]  }
  0xbb   :  { %215 = vrot.lane.b32.xlu0 %v196_v38, %s1527_s8  ;;  %v256_v60 = vsel %vm242_vm6, %v252_v58, %v255_v57  ;;  %v313_v18 = vrot.slane %v271_v12, 3  ;;  %v1263_v38 = vld [vmem:[#allocation9 + $0x10] sm:$0xff]  }
  0xbc   :  { %259 = vrot.lane.b32.xlu1 %v248_v36, %s1528_s2 }
  0xbd   :  { %424 = vmatpush1.bf16.msra.mxu0 %v1257_v55 }
  0xbe   :  { %425 = vmatprep.subr.bf16.mxu0 %v1526_v0 }
  0xbf   :  { %257 = vrot.lane.b32.xlu0 %v249_v49, %s1528_s2 }
  0xc0   :  { %221 = vrot.lane.b32.xlu1 %v214_v53, %s1527_s8 }
  0xc1   :  { %426 = vmatpush1.bf16.msra.mxu0 %v1258_v59 }
  0xc2   :  { %427 = vmatprep.subr.bf16.mxu0 %v1526_v0 }
  0xc3   :  { %219 = vrot.lane.b32.xlu0 %v211_v56, %s1527_s8 }
  0xc4   :  { %263 = vrot.lane.b32.xlu1 %v255_v57, %s1528_s2 }
  0xc5   :  { %428 = vmatpush1.bf16.msra.mxu0 %v1259_v61 }
  0xc6   :  { %429 = vmatprep.subr.bf16.mxu0 %v1526_v0 }
  0xc7   :  { %261 = vrot.lane.b32.xlu0 %v256_v60, %s1528_s2 }
  0xc9   :  { %430 = vmatpush1.bf16.msra.mxu0 %v1260_v62 }
  0xca   :  { %987 = vmatprep.subr.bf16.mxu0 %v1526_v0 }
 0x122   :  { %v237_v63 = vpop.permute.xlu1 %236 }
 0x125   :  { %v239_v1 = vpop.permute.xlu0 %238 }
 0x126   :  { %v241_v2 = vpop.permute.xlu1 %240 }
 0x129   :  { %v218_v3 = vpop.permute.xlu0 %217 }
 0x12a   :  { %v235_v6 = vpop.permute.xlu1 %234  ;;  %v276_v8 = vsel %vm272_vm7, %v1730_v7, %v218_v3 }
 0x12b   :  { %v285_v14 = vsel %vm281_vm10, %v276_v8, %v237_v63  ;;  %v1269_v63 = vld [vmem:[#allocation9 + $0x40] sm:$0xff]  }
 0x12d   :  { %v216_v9 = vpop.permute.xlu0 %215 }
 0x12e   :  { %v274_v13 = vsel %vm272_vm7, %v1742_v16, %v216_v9  ;;  %v260_v15 = vpop.permute.xlu1 %259  ;;  %v315_v16 = vsel %vm303_vm9, %v313_v18, %v314_v19 }
 0x12f   :  { %v294_v17 = vsel %vm290_vm11, %v285_v14, %v260_v15  ;;  %v283_v21 = vsel %vm281_vm10, %v274_v13, %v235_v6 }
 0x130   :  { %v305_v20 = vrot.slane %v294_v17, 3 }
 0x131   :  { %v258_v22 = vpop.permute.xlu0 %257 }
 0x132   :  { %v292_v7 = vsel %vm290_vm11, %v283_v21, %v258_v22  ;;  %v222_v24 = vpop.permute.xlu1 %221 }
 0x133   :  { %v304_v23 = vrot.slane %v292_v7, 3  ;;  %v280_v25 = vsel %vm272_vm7, %v1735_v11, %v222_v24 }
 0x134   :  { %v289_v29 = vsel %vm281_vm10, %v280_v25, %v241_v2 }
 0x135   :  { %v220_v26 = vpop.permute.xlu0 %219  ;;  %v306_v27 = vsel %vm303_vm9, %v304_v23, %v305_v20 }
 0x136   :  { %v278_v28 = vsel %vm272_vm7, %v1733_v10, %v220_v26  ;;  %444 = vmatmul.mubr.bf16.vlgmr.msra.gmra.mrb[0].mxu0 %v306_v27  ;;  %v264_v30 = vpop.permute.xlu1 %263  ;;  %v1262_v10 = vld [vmem:[#allocation9 + $0x8] sm:$0xff]  }
 0x137   :  { %1186 = vmatprep.mubr.msk.bf16.mxu0 %vm272_vm7, %v315_v16  ;;  %v298_v31 = vsel %vm290_vm11, %v289_v29, %v264_v30  ;;  %v287_v33 = vsel %vm281_vm10, %v278_v28, %v239_v1  ;;  %702 = vmatpush1.bf16.msra.mxu1 %v1262_v10 }
 0x138   :  { %v311_v32 = vrot.slane %v298_v31, 3  ;;  %703 = vmatprep.subr.bf16.mxu1 %v1526_v0 }
 0x139   :  { %v262_v11 = vpop.permute.xlu0 %261 }
 0x13a   :  { %v296_v34 = vsel %vm290_vm11, %v287_v33, %v262_v11 }
 0x13b   :  { %v310_v35 = vrot.slane %v296_v34, 3  ;;  %704 = vmatpush1.bf16.msra.mxu1 %v1263_v38 }
 0x13c   :  { %705 = vmatprep.subr.bf16.mxu1 %v1526_v0 }
 0x13d   :  { %v312_v36 = vsel %vm303_vm9, %v310_v35, %v311_v32 }
 0x13e   :  { %452 = vmatmul.mubr.bf16.gmra.mrb[4].mxu0 %v312_v36 }
 0x13f   :  { %706 = vmatpush1.bf16.msra.mxu1 %v1264_v39 }
 0x140   :  { %707 = vmatprep.subr.bf16.mxu1 %v1526_v0 }
 0x143   :  { %708 = vmatpush1.bf16.msra.mxu1 %v1265_v40 }
 0x144   :  { %709 = vmatprep.subr.bf16.mxu1 %v1526_v0 }
 0x147   :  { %710 = vmatpush1.bf16.msra.mxu1 %v1266_v41 }
 0x148   :  { %711 = vmatprep.subr.bf16.mxu1 %v1526_v0 }
 0x14b   :  { %712 = vmatpush1.bf16.msra.mxu1 %v1267_v42 }
 0x14c   :  { %713 = vmatprep.subr.bf16.mxu1 %v1526_v0 }
 0x14f   :  { %714 = vmatpush1.bf16.msra.mxu1 %v1268_v54 }
 0x150   :  { %715 = vmatprep.subr.bf16.mxu1 %v1526_v0 }
 0x153   :  { %716 = vmatpush1.bf16.msra.mxu1 %v1269_v63 }
 0x154   :  { %717 = vmatprep.subr.bf16.mxu1 %v1526_v0 }
 0x157   :  { %718 = vmatpush1.bf16.msra.mxu1 %v1270_v5 }
 0x209   :  { %v445_v44 = vpop.f32.mrb[0].mxu0 }
 0x20a   :  { %v446_v45 = vadd.f32 %v1174_v43, %v445_v44  ;;  %v447_v46 = vpop.f32.mrb[1].mxu0 }
 0x20b   :  { %v448_v47 = vpop.f32.mrb[2].mxu0 }
 0x20c   :  { %v449_v48 = vadd.f32 %v1174_v43, %v448_v47  ;;  %v450_v49 = vpop.f32.mrb[3].mxu0  ;;  %v460_v50 = vmax.f32 %v446_v45, 0.0 }
 0x20e   :  { %v461_v51 = vmax.f32 %v449_v48, 0.0 }
 0x210   :  { %v464_v52 = vpack.c.bf16 %v461_v51, %v460_v50 }
 0x211   :  { %v453_v53 = vpop.f32.mrb[4].mxu0 }
 0x212   :  { %v468_v55 = vrot.slane %v464_v52, 4  ;;  %v454_v56 = vadd.f32 %v1174_v43, %v453_v53  ;;  %v455_v57 = vpop.f32.mrb[5].mxu0 }
 0x213   :  { %v456_v58 = vpop.f32.mrb[6].mxu0 }
 0x214   :  { %472 = vst.msk [vmem:[#allocation2] sm:$0xf0] %vm174_vm3, %v468_v55  ;;  %v457_v59 = vadd.f32 %v1174_v43, %v456_v58  ;;  %v458_v60 = vpop.f32.mrb[7].mxu0  ;;  %v462_v61 = vmax.f32 %v454_v56, 0.0 }
 0x215   :  { %473 = vst.msk [vmem:[#allocation2 + $0x8] sm:$0xf] %vm176_vm2, %v468_v55 }
 0x216   :  { %v463_v62 = vmax.f32 %v457_v59, 0.0 }
 0x218   :  { %v465_v1 = vpack.c.bf16 %v463_v62, %v462_v61 }
 0x21a   :  { %v469_v2 = vrot.slane %v465_v1, 4 }
 0x21b   :  { %v1818_v4 = vld [vmem:[#allocation2] sm:$0xff] }
 0x21c   :  { %v1816_v3 = vld [vmem:[#allocation2 + $0x8] sm:$0xff]  ;;  %474 = vst.msk [vmem:[#allocation2 + $0x10] sm:$0xf0] %vm174_vm3, %v469_v2  ;;  %v522_v8 = vrot.slane %v1818_v4, 1  ;;  %v558_v13 = vrot.slane %v1818_v4, 2  ;;  %v481_v15 = vshrl.u32 %v1818_v4, 16 }
 0x21d   :  { %475 = vst.msk [vmem:[#allocation2 + $0x18] sm:$0xf] %vm176_vm2, %v469_v2  ;;  %v523_v6 = vrot.slane %v1816_v3, 1  ;;  %v488_v9 = vshll.u32 %v1816_v3, 16  ;;  %v492_v12 = vshrl.u32 %v1816_v3, 16  ;;  %v559_v14 = vrot.slane %v1816_v3, 2 }
 0x21e   :  { %v483_v17 = vshll.u32 %v1818_v4, 16  ;;  %v536_v24 = vrot.slane %v481_v15, 1 }
 0x21f   :  { %530 = vrot.lane.b32.xlu1 %v523_v6, %s1517_s21  ;;  %v524_v18 = vsel %vm227_vm4, %v522_v8, %v523_v6  ;;  %v490_v19 = vrot.slane %v488_v9, 1  ;;  %v539_v20 = vrot.slane %v492_v12, 1  ;;  %v540_v21 = vrot.slane %v488_v9, 2 }
 0x220   :  { %528 = vrot.lane.b32.xlu0 %v524_v18, %s1517_s21  ;;  %v560_v22 = vsel %vm265_vm8, %v558_v13, %v559_v14  ;;  %v596_v7 = vrot.slane %v559_v14, 3  ;;  %v485_v23 = vrot.slane %v483_v17, 1  ;;  %v537_v26 = vrot.slane %v483_v17, 2 }
 0x221   :  { %v494_v25 = vor.u32 %v492_v12, %v490_v19  ;;  %v595_v16 = vrot.slane %v560_v22, 3  ;;  %v541_v30 = vor.u32 %v540_v21, %v539_v20 }
 0x222   :  { %v486_v27 = vor.u32 %v485_v23, %v481_v15  ;;  %v538_v31 = vor.u32 %v537_v26, %v536_v24 }
 0x223   :  { %512 = vrot.lane.b32.xlu1 %v494_v25, %s1527_s8  ;;  %v597_v28 = vsel %vm303_vm9, %v595_v16, %v596_v7  ;;  %v478_v33 = vld [vmem:[#allocation2 + $0x10] sm:$0xff] }
 0x224   :  { %1198 = vmatprep.mubr.msk.bf16.mxu1 %vm272_vm7, %v597_v28  ;;  %v491_v29 = vsel %vm184_vm5, %v486_v27, %v490_v19  ;;  %v479_v32 = vld [vmem:[#allocation2 + $0x18] sm:$0xff]  ;;  %v498_v34 = vshll.u32 %v478_v33, 16  ;;  %v525_v36 = vrot.slane %v478_v33, 1  ;;  %v542_v37 = vsel %vm242_vm6, %v538_v31, %v541_v30 }
 0x225   :  { %510 = vrot.lane.b32.xlu0 %v491_v29, %s1527_s8  ;;  %v503_v11 = vshll.u32 %v479_v32, 16  ;;  %v526_v35 = vrot.slane %v479_v32, 1  ;;  %v507_v10 = vshrl.u32 %v479_v32, 16  ;;  %v496_v38 = vshrl.u32 %v478_v33, 16  ;;  %v1271_v27 = vld [vmem:[#allocation12] sm:$0xff]   ;;  %v1272_v28 = vld [vmem:[#allocation12 + $0x8] sm:$0xff]  }
 0x226   :  { %v500_v39 = vrot.slane %v498_v34, 1  ;;  %v544_v46 = vrot.slane %v498_v34, 2  ;;  %v561_v55 = vrot.slane %v478_v33, 2  ;;  %v562_v56 = vrot.slane %v479_v32, 2  ;;  %988 = vmatpush1.bf16.msra.mxu0 %v1271_v27  ;;  %v1273_v29 = vld [vmem:[#allocation12 + $0x10] sm:$0xff]   ;;  %v1275_v31 = vld [vmem:[#allocation12 + $0x20] sm:$0xff]  }
 0x227   :  { %552 = vrot.lane.b32.xlu1 %v541_v30, %s1528_s2  ;;  %v505_v40 = vrot.slane %v503_v11, 1  ;;  %v527_v41 = vsel %vm227_vm4, %v525_v36, %v526_v35  ;;  %v547_v42 = vrot.slane %v503_v11, 2  ;;  %v546_v44 = vrot.slane %v507_v10, 1  ;;  %989 = vmatprep.subr.bf16.mxu0 %v1526_v0  ;;  %v1274_v30 = vld [vmem:[#allocation12 + $0x18] sm:$0xff]  }
 0x228   :  { %v501_v43 = vor.u32 %v500_v39, %v496_v38  ;;  %v543_v45 = vrot.slane %v496_v38, 1  ;;  %v563_v62 = vsel %vm265_vm8, %v561_v55, %v562_v56  ;;  %v602_v9 = vrot.slane %v562_v56, 3  ;;  %v1187_v11 = vld [vmem:[#allocation11] ss:$0 sm:$0xff] }
 0x229   :  { %550 = vrot.lane.b32.xlu0 %v542_v37, %s1528_s2  ;;  %v509_v47 = vor.u32 %v507_v10, %v505_v40  ;;  %v548_v49 = vor.u32 %v547_v42, %v546_v44  ;;  %v601_v8 = vrot.slane %v563_v62, 3  ;;  %v1278_v42 = vld [vmem:[#allocation12 + $0x38] sm:$0xff]  }
 0x22a   :  { %v506_v48 = vsel %vm184_vm5, %v501_v43, %v505_v40  ;;  %v545_v50 = vor.u32 %v544_v46, %v543_v45  ;;  %990 = vmatpush1.bf16.msra.mxu0 %v1272_v28 }
 0x22b   :  { %534 = vrot.lane.b32.xlu1 %v526_v35, %s1517_s21  ;;  %v603_v14 = vsel %vm303_vm9, %v601_v8, %v602_v9  ;;  %991 = vmatprep.subr.bf16.mxu0 %v1526_v0 }
 0x22c   :  { %v549_v51 = vsel %vm242_vm6, %v545_v50, %v548_v49  ;;  %v1279_v50 = vld [vmem:[#allocation12 + $0x40] sm:$0xff]  }
 0x22d   :  { %532 = vrot.lane.b32.xlu0 %v527_v41, %s1517_s21 }
 0x22e   :  { %992 = vmatpush1.bf16.msra.mxu0 %v1273_v29 }
 0x22f   :  { %516 = vrot.lane.b32.xlu1 %v509_v47, %s1527_s8  ;;  %993 = vmatprep.subr.bf16.mxu0 %v1526_v0 }
 0x231   :  { %514 = vrot.lane.b32.xlu0 %v506_v48, %s1527_s8 }
 0x232   :  { %994 = vmatpush1.bf16.msra.mxu0 %v1274_v30 }
 0x233   :  { %556 = vrot.lane.b32.xlu1 %v548_v49, %s1528_s2  ;;  %995 = vmatprep.subr.bf16.mxu0 %v1526_v0 }
 0x235   :  { %554 = vrot.lane.b32.xlu0 %v549_v51, %s1528_s2 }
 0x236   :  { %996 = vmatpush1.bf16.msra.mxu0 %v1275_v31 }
 0x237   :  { %997 = vmatprep.subr.bf16.mxu0 %v1526_v0 }
 0x291   :  { %v531_v52 = vpop.permute.xlu1 %530 }
 0x292   :  { %v529_v53 = vpop.permute.xlu0 %528 }
 0x295   :  { %v513_v54 = vpop.permute.xlu1 %512 }
 0x296   :  { %v567_v57 = vsel %vm272_vm7, %v1816_v3, %v513_v54 }
 0x297   :  { %v511_v58 = vpop.permute.xlu0 %510  ;;  %v575_v60 = vsel %vm281_vm10, %v567_v57, %v531_v52 }
 0x298   :  { %v565_v59 = vsel %vm272_vm7, %v1818_v4, %v511_v58 }
 0x299   :  { %v553_v61 = vpop.permute.xlu1 %552  ;;  %v573_v2 = vsel %vm281_vm10, %v565_v59, %v529_v53  ;;  %v1280_v59 = vld [vmem:[#allocation12 + $0x48] sm:$0xff]  }
 0x29a   :  { %v583_v63 = vsel %vm290_vm11, %v575_v60, %v553_v61 }
 0x29b   :  { %v593_v1 = vrot.slane %v583_v63, 3  ;;  %v551_v5 = vpop.permute.xlu0 %550 }
 0x29c   :  { %v581_v6 = vsel %vm290_vm11, %v573_v2, %v551_v5 }
 0x29d   :  { %v592_v3 = vrot.slane %v581_v6, 3  ;;  %v535_v12 = vpop.permute.xlu1 %534 }
 0x29f   :  { %v533_v13 = vpop.permute.xlu0 %532  ;;  %v594_v4 = vsel %vm303_vm9, %v592_v3, %v593_v1 }
 0x2a0   :  { %732 = vmatmul.mubr.bf16.vlgmr.msra.gmra.mrb[0].mxu1 %v594_v4 }
 0x2a1   :  { %1199 = vmatprep.mubr.msk.bf16.mxu1 %vm272_vm7, %v603_v14  ;;  %v517_v15 = vpop.permute.xlu1 %516 }
 0x2a2   :  { %v571_v17 = vsel %vm272_vm7, %v479_v32, %v517_v15  ;;  %v1276_v32 = vld [vmem:[#allocation12 + $0x28] sm:$0xff]  }
 0x2a3   :  { %v515_v18 = vpop.permute.xlu0 %514  ;;  %v579_v20 = vsel %vm281_vm10, %v571_v17, %v535_v12  ;;  %998 = vmatpush1.bf16.msra.mxu0 %v1276_v32 }
 0x2a4   :  { %v569_v19 = vsel %vm272_vm7, %v478_v33, %v515_v18  ;;  %v1277_v33 = vld [vmem:[#allocation12 + $0x30] sm:$0xff]   ;;  %999 = vmatprep.subr.bf16.mxu0 %v1526_v0 }
 0x2a5   :  { %v557_v21 = vpop.permute.xlu1 %556  ;;  %v577_v23 = vsel %vm281_vm10, %v569_v19, %v533_v13 }
 0x2a6   :  { %v587_v22 = vsel %vm290_vm11, %v579_v20, %v557_v21 }
 0x2a7   :  { %v599_v7 = vrot.slane %v587_v22, 3  ;;  %v555_v24 = vpop.permute.xlu0 %554  ;;  %1000 = vmatpush1.bf16.msra.mxu0 %v1277_v33 }
 0x2a8   :  { %v585_v25 = vsel %vm290_vm11, %v577_v23, %v555_v24  ;;  %1001 = vmatprep.subr.bf16.mxu0 %v1526_v0 }
 0x2a9   :  { %v598_v16 = vrot.slane %v585_v25, 3 }
 0x2ab   :  { %v600_v26 = vsel %vm303_vm9, %v598_v16, %v599_v7  ;;  %1002 = vmatpush1.bf16.msra.mxu0 %v1278_v42 }
 0x2ac   :  { %740 = vmatmul.mubr.bf16.gmra.mrb[4].mxu1 %v600_v26  ;;  %1003 = vmatprep.subr.bf16.mxu0 %v1526_v0 }
 0x2af   :  { %1004 = vmatpush1.bf16.msra.mxu0 %v1279_v50 }
 0x2b0   :  { %1005 = vmatprep.subr.bf16.mxu0 %v1526_v0 }
 0x2b3   :  { %1006 = vmatpush1.bf16.msra.mxu0 %v1280_v59 }
 0x373   :  { %v733_v34 = vpop.f32.mrb[0].mxu1 }
 0x374   :  { %v734_v35 = vadd.f32 %v1187_v11, %v733_v34  ;;  %v735_v36 = vpop.f32.mrb[1].mxu1 }
 0x375   :  { %v736_v37 = vpop.f32.mrb[2].mxu1 }
 0x376   :  { %v737_v10 = vadd.f32 %v1187_v11, %v736_v37  ;;  %v738_v38 = vpop.f32.mrb[3].mxu1  ;;  %v748_v39 = vmax.f32 %v734_v35, 0.0 }
 0x378   :  { %v749_v40 = vmax.f32 %v737_v10, 0.0 }
 0x37a   :  { %v752_v41 = vpack.c.bf16 %v749_v40, %v748_v39 }
 0x37c   :  { %v756_v43 = vrot.slane %v752_v41, 4 }
 0x37e   :  { %760 = vst.msk [vmem:[#allocation2] sm:$0xf0] %vm174_vm3, %v756_v43 }
 0x37f   :  { %761 = vst.msk [vmem:[#allocation2 + $0x8] sm:$0xf] %vm176_vm2, %v756_v43  ;;  %v741_v44 = vpop.f32.mrb[4].mxu1 }
 0x380   :  { %v742_v45 = vadd.f32 %v1187_v11, %v741_v44  ;;  %v743_v46 = vpop.f32.mrb[5].mxu1 }
 0x381   :  { %v744_v47 = vpop.f32.mrb[6].mxu1 }
 0x382   :  { %v745_v48 = vadd.f32 %v1187_v11, %v744_v47  ;;  %v746_v49 = vpop.f32.mrb[7].mxu1  ;;  %v750_v51 = vmax.f32 %v742_v45, 0.0 }
 0x384   :  { %v751_v52 = vmax.f32 %v745_v48, 0.0 }
 0x385   :  { %v1882_v54 = vld [vmem:[#allocation2] sm:$0xff] }
 0x386   :  { %v1880_v53 = vld [vmem:[#allocation2 + $0x8] sm:$0xff]  ;;  %v753_v55 = vpack.c.bf16 %v751_v52, %v750_v51  ;;  %v810_v57 = vrot.slane %v1882_v54, 1  ;;  %v846_v61 = vrot.slane %v1882_v54, 2  ;;  %v769_v63 = vshrl.u32 %v1882_v54, 16 }
 0x387   :  { %v811_v56 = vrot.slane %v1880_v53, 1  ;;  %v776_v58 = vshll.u32 %v1880_v53, 16  ;;  %v780_v60 = vshrl.u32 %v1880_v53, 16  ;;  %v847_v62 = vrot.slane %v1880_v53, 2 }
 0x388   :  { %v757_v1 = vrot.slane %v753_v55, 4  ;;  %v771_v5 = vshll.u32 %v1882_v54, 16  ;;  %v824_v14 = vrot.slane %v769_v63, 1 }
 0x389   :  { %818 = vrot.lane.b32.xlu1 %v811_v56, %s1517_s21  ;;  %v812_v0 = vsel %vm227_vm4, %v810_v57, %v811_v56  ;;  %v778_v2 = vrot.slane %v776_v58, 1  ;;  %v848_v6 = vsel %vm265_vm8, %v846_v61, %v847_v62  ;;  %v884_v8 = vrot.slane %v847_v62, 3 }
 0x38a   :  { %816 = vrot.lane.b32.xlu0 %v812_v0, %s1517_s21  ;;  %v827_v9 = vrot.slane %v780_v60, 1  ;;  %v828_v3 = vrot.slane %v776_v58, 2  ;;  %762 = vst.msk [vmem:[#allocation2 + $0x10] sm:$0xf0] %vm174_vm3, %v757_v1  ;;  %v883_v13 = vrot.slane %v848_v6, 3  ;;  %v773_v4 = vrot.slane %v771_v5, 1 }
 0x38b   :  { %763 = vst.msk [vmem:[#allocation2 + $0x18] sm:$0xf] %vm176_vm2, %v757_v1  ;;  %v782_v12 = vor.u32 %v780_v60, %v778_v2  ;;  %v825_v15 = vrot.slane %v771_v5, 2 }
 0x38c   :  { %v885_v17 = vsel %vm303_vm9, %v883_v13, %v884_v8  ;;  %v774_v18 = vor.u32 %v773_v4, %v769_v63  ;;  %v829_v19 = vor.u32 %v828_v3, %v827_v9 }
 0x38d   :  { %800 = vrot.lane.b32.xlu1 %v782_v12, %s1527_s8  ;;  %1211 = vmatprep.mubr.msk.bf16.mxu0 %vm272_vm7, %v885_v17  ;;  %v826_v20 = vor.u32 %v825_v15, %v824_v14  ;;  %v1281_v15 = vld [vmem:[#allocation15] sm:$0xff]   ;;  %v1282_v17 = vld [vmem:[#allocation15 + $0x8] sm:$0xff]  }
 0x38e   :  { %v779_v21 = vsel %vm184_vm5, %v774_v18, %v778_v2  ;;  %1222 = vmatprep.subr.bf16.mxu1 %v1281_v15  ;;  %v1200_v18 = vld [vmem:[#allocation14] ss:$0 sm:$0xff] }
 0x38f   :  { %798 = vrot.lane.b32.xlu0 %v779_v21, %s1527_s8  ;;  %v830_v22 = vsel %vm242_vm6, %v826_v20, %v829_v19  ;;  %1223 = vmatpush3.bf16.msra.mxu1 %v1281_v15 }
 0x390   :  { %1224 = vmatprep.subr.bf16.mxu1 %v1282_v17 }
 0x391   :  { %840 = vrot.lane.b32.xlu1 %v829_v19, %s1528_s2  ;;  %v766_v23 = vld [vmem:[#allocation2 + $0x10] sm:$0xff] }
 0x392   :  { %v767_v7 = vld [vmem:[#allocation2 + $0x18] sm:$0xff]  ;;  %v813_v25 = vrot.slane %v766_v23, 1  ;;  %v784_v27 = vshrl.u32 %v766_v23, 16  ;;  %v786_v28 = vshll.u32 %v766_v23, 16  ;;  %v849_v44 = vrot.slane %v766_v23, 2 }
 0x393   :  { %v814_v24 = vrot.slane %v767_v7, 1  ;;  %v791_v16 = vshll.u32 %v767_v7, 16  ;;  %v795_v26 = vshrl.u32 %v767_v7, 16  ;;  %838 = vrot.lane.b32.xlu0 %v830_v22, %s1528_s2  ;;  %v850_v45 = vrot.slane %v767_v7, 2  ;;  %1225 = vmatpush3.bf16.msra.mxu1 %v1282_v17 }
 0x394   :  { %v788_v31 = vrot.slane %v786_v28, 1  ;;  %v831_v34 = vrot.slane %v784_v27, 1  ;;  %v832_v35 = vrot.slane %v786_v28, 2 }
 0x395   :  { %822 = vrot.lane.b32.xlu1 %v814_v24, %s1517_s21  ;;  %v815_v29 = vsel %vm227_vm4, %v813_v25, %v814_v24  ;;  %v793_v30 = vrot.slane %v791_v16, 1  ;;  %v834_v32 = vrot.slane %v795_v26, 1  ;;  %v835_v11 = vrot.slane %v791_v16, 2 }
 0x396   :  { %v789_v36 = vor.u32 %v788_v31, %v784_v27  ;;  %v833_v38 = vor.u32 %v832_v35, %v831_v34  ;;  %v851_v51 = vsel %vm265_vm8, %v849_v44, %v850_v45  ;;  %v890_v59 = vrot.slane %v850_v45, 3  ;;  %v1213_v45 = vld [vmem:[#allocation17] ss:$0 sm:$0xff] }
 0x397   :  { %v797_v33 = vor.u32 %v795_v26, %v793_v30  ;;  %820 = vrot.lane.b32.xlu0 %v815_v29, %s1517_s21  ;;  %v836_v10 = vor.u32 %v835_v11, %v834_v32  ;;  %v889_v58 = vrot.slane %v851_v51, 3  ;;  %s1529_s21 = smov [#allocation18]  }
 0x398   :  { %v794_v37 = vsel %vm184_vm5, %v789_v36, %v793_v30  ;;  %s1154_s20 = sshll.u32 %s1529_s21, 4  ;;  %s1155_s20 = int_to_ptr.vmem [resolvable:$true] %s1154_s20 }
 0x399   :  { %804 = vrot.lane.b32.xlu1 %v797_v33, %s1527_s8  ;;  %v837_v39 = vsel %vm242_vm6, %v833_v38, %v836_v10  ;;  %v891_v62 = vsel %vm303_vm9, %v889_v58, %v890_v59  ;;  %s1481_s17 = scalar_lea.vmem %s1155_s20, 512  ;;  %p1486_p3 = scmp.lt.s32.totalorder %s1155_s20, %s1155_s20 }
 0x39a   :  { %p1482_p2 = scmp.ne.s32.totalorder %s1155_s20, %s1481_s17  ;;  %p1487_p4 = scmp.lt.s32.totalorder %s1481_s17, %s1481_s17 }
 0x39b   :  { %802 = vrot.lane.b32.xlu0 %v794_v37, %s1527_s8 }
 0x39c   :  { %p1488_p5 = por %p1487_p4, %p1486_p3 }
 0x39d   :  { %844 = vrot.lane.b32.xlu1 %v836_v10, %s1528_s2 }
 0x39e   :  { %p1489_p6 = pnand %p1488_p5, %p1482_p2 }
 0x39f   :  { %842 = vrot.lane.b32.xlu0 %v837_v39, %s1528_s2 }
 0x3fb   :  { %v819_v40 = vpop.permute.xlu1 %818 }
 0x3fc   :  { %v817_v41 = vpop.permute.xlu0 %816 }
 0x3ff   :  { %v801_v42 = vpop.permute.xlu1 %800 }
 0x400   :  { %v855_v43 = vsel %vm272_vm7, %v1880_v53, %v801_v42 }
 0x401   :  { %v799_v46 = vpop.permute.xlu0 %798  ;;  %v863_v48 = vsel %vm281_vm10, %v855_v43, %v819_v40 }
 0x402   :  { %v853_v47 = vsel %vm272_vm7, %v1882_v54, %v799_v46 }
 0x403   :  { %v841_v49 = vpop.permute.xlu1 %840  ;;  %v861_v55 = vsel %vm281_vm10, %v853_v47, %v817_v41 }
 0x404   :  { %v871_v50 = vsel %vm290_vm11, %v863_v48, %v841_v49 }
 0x405   :  { %v881_v52 = vrot.slane %v871_v50, 3  ;;  %v839_v56 = vpop.permute.xlu0 %838 }
 0x406   :  { %v869_v57 = vsel %vm290_vm11, %v861_v55, %v839_v56 }
 0x407   :  { %v823_v53 = vpop.permute.xlu1 %822  ;;  %v880_v60 = vrot.slane %v869_v57, 3 }
 0x409   :  { %v821_v61 = vpop.permute.xlu0 %820  ;;  %v882_v54 = vsel %vm303_vm9, %v880_v60, %v881_v52 }
 0x40a   :  { %1020 = vmatmul.mubr.bf16.vlgmr.msra.gmra.mrb[8].mxu0 %v882_v54 }
 0x40b   :  { %v805_v63 = vpop.permute.xlu1 %804  ;;  %1212 = vmatprep.mubr.msk.bf16.mxu0 %vm272_vm7, %v891_v62 }
 0x40c   :  { %v859_v1 = vsel %vm272_vm7, %v767_v7, %v805_v63 }
 0x40d   :  { %v803_v0 = vpop.permute.xlu0 %802  ;;  %v867_v5 = vsel %vm281_vm10, %v859_v1, %v823_v53 }
 0x40e   :  { %v857_v2 = vsel %vm272_vm7, %v766_v23, %v803_v0 }
 0x40f   :  { %v845_v6 = vpop.permute.xlu1 %844  ;;  %v865_v3 = vsel %vm281_vm10, %v857_v2, %v821_v61 }
 0x410   :  { %v875_v8 = vsel %vm290_vm11, %v867_v5, %v845_v6 }
 0x411   :  { %v887_v9 = vrot.slane %v875_v8, 3  ;;  %v843_v12 = vpop.permute.xlu0 %842 }
 0x412   :  { %v873_v13 = vsel %vm290_vm11, %v865_v3, %v843_v12 }
 0x413   :  { %v886_v4 = vrot.slane %v873_v13, 3 }
 0x415   :  { %v888_v14 = vsel %vm303_vm9, %v886_v4, %v887_v9 }
 0x416   :  { %1028 = vmatmul.mubr.bf16.gmra.mrb[12].mxu0 %v888_v14 }
 0x4dd   :  { %v1021_v19 = vpop.f32.mrb[8].mxu0 }
 0x4de   :  { %v1022_v20 = vadd.f32 %v1200_v18, %v1021_v19  ;;  %v1023_v21 = vpop.f32.mrb[9].mxu0 }
 0x4df   :  { %v1024_v22 = vpop.f32.mrb[10].mxu0 }
 0x4e0   :  { %v1025_v7 = vadd.f32 %v1200_v18, %v1024_v22  ;;  %v1026_v23 = vpop.f32.mrb[11].mxu0  ;;  %v1036_v24 = vmax.f32 %v1022_v20, 0.0 }
 0x4e2   :  { %v1037_v25 = vmax.f32 %v1025_v7, 0.0 }
 0x4e4   :  { %v1040_v16 = vpack.c.bf16 %v1037_v25, %v1036_v24 }
 0x4e6   :  { %v1044_v26 = vrot.slane %v1040_v16, 4 }
 0x4e8   :  { %1048 = vst.msk [vmem:[#allocation2] sm:$0xf0] %vm174_vm3, %v1044_v26 }
 0x4e9   :  { %1049 = vst.msk [vmem:[#allocation2 + $0x8] sm:$0xf] %vm176_vm2, %v1044_v26  ;;  %v1029_v27 = vpop.f32.mrb[12].mxu0 }
 0x4ea   :  { %v1030_v28 = vadd.f32 %v1200_v18, %v1029_v27  ;;  %v1031_v29 = vpop.f32.mrb[13].mxu0 }
 0x4eb   :  { %v1032_v30 = vpop.f32.mrb[14].mxu0 }
 0x4ec   :  { %v1033_v31 = vadd.f32 %v1200_v18, %v1032_v30  ;;  %v1034_v32 = vpop.f32.mrb[15].mxu0  ;;  %v1038_v33 = vmax.f32 %v1030_v28, 0.0 }
 0x4ee   :  { %v1039_v11 = vmax.f32 %v1033_v31, 0.0 }
 0x4ef   :  { %v1052_v34 = vld [vmem:[#allocation2] sm:$0xf0] }
 0x4f0   :  { %v1053_v35 = vld [vmem:[#allocation2 + $0x8] sm:$0xf]  ;;  %v1041_v36 = vpack.c.bf16 %v1039_v11, %v1038_v33  ;;  %v1061_v37 = vrot.slane %v1052_v34, 4 }
 0x4f1   :  { %v1062_v10 = vrot.slane %v1053_v35, 4 }
 0x4f2   :  { %v1045_v38 = vrot.slane %v1041_v36, 4 }
 0x4f3   :  { %v1063_v39 = vsel %vm1060_vm12, %v1061_v37, %v1062_v10 }
 0x4f4   :  { %1226 = vmatprep.mubr.msk.bf16.mxu1 %vm272_vm7, %v1063_v39  ;;  %1050 = vst.msk [vmem:[#allocation2 + $0x10] sm:$0xf0] %vm174_vm3, %v1045_v38 }
 0x4f5   :  { %1051 = vst.msk [vmem:[#allocation2 + $0x18] sm:$0xf] %vm176_vm2, %v1045_v38 }
 0x4fb   :  { %v1054_v40 = vld [vmem:[#allocation2 + $0x10] sm:$0xf0] }
 0x4fc   :  { %v1055_v41 = vld [vmem:[#allocation2 + $0x18] sm:$0xf]  ;;  %v1064_v42 = vrot.slane %v1054_v40, 4 }
 0x4fd   :  { %v1065_v43 = vrot.slane %v1055_v41, 4 }
 0x4ff   :  { %v1066_v44 = vsel %vm1060_vm12, %v1064_v42, %v1065_v43 }
 0x500   :  { %1227 = vmatmul.mubr.msk.bf16.vlgmr.msra.gmra.mrb[8].mxu1 %vm272_vm7, %v1066_v44 }
 0x5d3   :  { %v1228_v46 = vpop.f32.mrb[8].mxu1 }
 0x5d4   :  { %v1139_v47 = vadd.f32 %v1228_v46, %v1213_v45  ;;  %v1130_v48 = vpop.f32.mrb[9].mxu1 }
 0x5d5   :  { %v1131_v49 = vadd.f32 %v1213_v45, %v1130_v48  ;;  %v1229_v50 = vpop.f32.mrb[10].mxu1 }
 0x5d6   :  { %1147 = vst.msk [vmem:[#allocation18 + $0x10] sm:$0xff] %vm272_vm7, %v1139_v47  ;;  %v1142_v51 = vadd.f32 %v1229_v50, %v1213_v45  ;;  %v1133_v52 = vpop.f32.mrb[11].mxu1 }
 0x5d7   :  { %1145 = vst.msk [vmem:[#allocation18] sm:$0xff] %vm272_vm7, %v1131_v49  ;;  %v1134_v55 = vadd.f32 %v1213_v45, %v1133_v52 }
 0x5d8   :  { %1148 = vst.msk [vmem:[#allocation18 + $0x18] sm:$0xff] %vm272_vm7, %v1142_v51 }
 0x5d9   :  { %1146 = vst.msk [vmem:[#allocation18 + $0x8] sm:$0xff] %vm272_vm7, %v1134_v55 }
 0x5da   :  { %1492 = shalt.err (!%p1489_p6)
}
 0x5db   :  { %s1493_s30 = scalar_lea.hbm %s1966_s9, 512 }
 0x5dc   :  { %p1494_p7 = scmp.ne.s32.totalorder %s1966_s9, %s1493_s30  ;;  %p1497_p8 = scmp.lt.u32.totalorder %s1493_s30, %s1966_s9 }
 0x5de   :  { %p1499_p9 = pnand %p1497_p8, %p1494_p7 }
 0x5e0   :  { %1502 = shalt.err (!%p1499_p9)
}
 0x5e1   :  { %s1530_s14 = smov 128   ;;  %s1531_s5 = smov 8  }
 0x5e2   :  { %1160 = dma.vmem_to_hbm [thread:$0]  %s1155_s20, 512, %s1966_s9, [#allocation5], %s1530_s14, %s1530_s14, %s1531_s5  }
 0x5e3   :  { %1513 = dma.done.wait [#allocation5], 512  }
 0x5e4   :  { %1514 = vsyncadd [#allocation5], 4294966784 }
 0x5e5   :  { %1164 = vsyncpa [#allocation4], 1 }
 0x5e6   :  { %1165 = vsyncpa [#allocation7], 1 }
 0x5e7   :  { %1166 = vsyncpa [#allocation10], 1 }
 0x5e8   :  { %1167 = vsyncpa [#allocation13], 1 }
 0x5e9   :  { %1168 = vsyncpa [#allocation16], 1 }
 0x5ea   :  { %1169 = vsyncpa [#allocation5], 1 }

</bundles_post_ra>
